<compile_context>
chip_gen: v5e
topology: v5e:2x2
jax: 0.10.0
libtpu: 0.0.40
codegen_flags: <defaults>
</compile_context>

<pallas_src>
import numpy as np
import jax
import jax.numpy as jnp
from jax.experimental import pallas as pl
from jax.experimental.pallas import tpu as pltpu


# ---------------------------------------------------------------------------
# Host-side (numpy) 1-D linear-interpolation tables.  Matches PyTorch
# nn.Upsample(mode='trilinear') semantics for both align_corners settings.
# ---------------------------------------------------------------------------
def _linear_interp_1d(n_in, scale, align_corners):
    n_out = int(n_in * scale)
    idx0 = np.zeros(n_out, np.int32)
    idx1 = np.zeros(n_out, np.int32)
    w0 = np.zeros(n_out, np.float32)
    w1 = np.zeros(n_out, np.float32)
    for o in range(n_out):
        if align_corners:
            src = 0.0 if n_out <= 1 else o * (n_in - 1) / (n_out - 1)
        else:
            src = (o + 0.5) / scale - 0.5
            src = max(src, 0.0)
        i0 = int(np.floor(src))
        frac = src - i0
        i0c = min(max(i0, 0), n_in - 1)
        i1c = min(i0c + 1, n_in - 1)
        idx0[o], idx1[o] = i0c, i1c
        w0[o], w1[o] = 1.0 - frac, frac
    return idx0, idx1, w0, w1


def _upsample_matrix(n_in, scale, align_corners):
    i0, i1, w0, w1 = _linear_interp_1d(n_in, scale, align_corners)
    U = np.zeros((int(n_in * scale), n_in), np.float32)
    for o in range(U.shape[0]):
        U[o, i0[o]] += w0[o]
        U[o, i1[o]] += w1[o]
    return U


def _ceil_to(v, m):
    return ((v + m - 1) // m) * m


# ---------------------------------------------------------------------------
# up_conv forward: Conv3d(ch_in, ch_out, k=1) -> trilinear Upsample (x scale).
# Input/output layout: NCDHW (matches the PyTorch module).
# ---------------------------------------------------------------------------
def up_conv_forward(x, conv_w, conv_b, scale=2, align_corners=False):
    N, Cin, D, H, W = (int(s) for s in x.shape)
    Cout = int(conv_w.shape[0])
    s = int(scale)
    Dout, Hout, Wout = D * s, H * s, W * s

    # Compile-time depth tap tables (python ints/floats baked into the kernel).
    d_i0, d_i1, d_w0, d_w1 = _linear_interp_1d(D, s, align_corners)
    d_i0 = [int(v) for v in d_i0]
    d_i1 = [int(v) for v in d_i1]
    d_w0 = [float(v) for v in d_w0]
    d_w1 = [float(v) for v in d_w1]

    uh_np = _upsample_matrix(H, s, align_corners)          # (Hout, H)
    uwT_np = _upsample_matrix(W, s, align_corners).T       # (W, Wout)

    # bf16 feed for the MXU when the activations are bf16 (interp weights 0.25/0.75/1.0
    # are exactly representable); otherwise keep f32 operands.  Accumulation is f32.
    mm_dtype = jnp.bfloat16 if x.dtype == jnp.bfloat16 else jnp.float32

    w2d = conv_w.reshape(Cout, Cin).astype(jnp.float32)    # (Cout, Cin)
    # K = kron(Wconv, U_h): K[co*Hout+oh, ci*H+h] = w[co,ci] * Uh[oh,h]
    K = (w2d[:, None, :, None] * jnp.asarray(uh_np)[None, :, None, :]
         ).reshape(Cout * Hout, Cin * H).astype(mm_dtype)
    uwT = jnp.asarray(uwT_np).astype(mm_dtype)             # (W, Wout)
    # Bias expanded to one column per (co, oh) row of the kron output; added once per
    # source slab (valid because all interpolation rows sum to 1).
    b_col = jnp.repeat(conv_b.reshape(Cout).astype(jnp.float32), Hout
                       ).reshape(Cout * Hout, 1)

    # NOTE: the (Cin, H, W) -> (Cin*H, W) reshape below is layout-trivial when H is a
    # multiple of 8 (sublane tile); typical shapes satisfy this.
    def kernel(uwT_ref, k_ref, b_ref, x_ref, o_ref):
        kk = k_ref[...]                                     # (Cout*Hout, Cin*H)
        uw = uwT_ref[...]                                   # (W, Wout)
        bb = jnp.broadcast_to(b_ref[...], (Cout * Hout, Wout))  # hoisted broadcast

        # Per source depth: W-interp matmul, then fused conv+H-interp kron matmul.
        zs = []
        for dd in range(D):
            a_d = x_ref[0, :, dd, :, :].astype(mm_dtype)    # (Cin, H, W)
            t_d = jnp.dot(a_d.reshape(Cin * H, W), uw,
                          preferred_element_type=jnp.float32)     # (Cin*H, Wout)
            z_d = jnp.dot(kk, t_d.astype(mm_dtype),
                          preferred_element_type=jnp.float32) + bb  # (Cout*Hout, Wout)
            zs.append(z_d)

        # Depth blend with compile-time 2-tap weights, single store per output depth.
        for od in range(Dout):
            i0, i1 = d_i0[od], d_i1[od]
            w0, w1 = d_w0[od], d_w1[od]
            if i0 == i1 or w1 == 0.0:
                zz = zs[i0]
            elif w0 == 0.0:
                zz = zs[i1]
            else:
                zz = w0 * zs[i0] + w1 * zs[i1]
            o_ref[0, :, od, :, :] = zz.reshape(Cout, Hout, Wout).astype(o_ref.dtype)

    # ---- VMEM budget: padded double-buffered blocks + resident constants + f32
    #      intermediates + fixed margin, capped below the v7x 64 MiB physical VMEM. ----
    x_item = int(np.dtype(x.dtype).itemsize)
    mm_item = 2 if mm_dtype == jnp.bfloat16 else 4
    in_blk = Cin * D * _ceil_to(H, 8) * _ceil_to(W, 128) * x_item
    out_blk = Cout * Dout * _ceil_to(Hout, 8) * _ceil_to(Wout, 128) * x_item
    const_b = (_ceil_to(W, 8) * _ceil_to(Wout, 128)
               + _ceil_to(Cout * Hout, 8) * _ceil_to(Cin * H, 128)) * mm_item \
              + _ceil_to(Cout * Hout, 8) * 128 * 4
    interm = (Cin * _ceil_to(H, 8) * (_ceil_to(W, 128) + _ceil_to(Wout, 128))
              + (D + 2) * _ceil_to(Cout * Hout, 8) * _ceil_to(Wout, 128)) * 4
    est = 2 * in_blk + 2 * out_blk + 2 * const_b + interm
    vmem_limit = int(min(48 * 2**20, max(32 * 2**20, est + 8 * 2**20)))

    grid_spec = pltpu.PrefetchScalarGridSpec(
        num_scalar_prefetch=0,
        grid=(N,),
        in_specs=[
            pl.BlockSpec((W, Wout), lambda n: (0, 0)),                 # U_w^T (resident)
            pl.BlockSpec((Cout * Hout, Cin * H), lambda n: (0, 0)),    # kron(W, U_h)
            pl.BlockSpec((Cout * Hout, 1), lambda n: (0, 0)),          # expanded bias
            pl.BlockSpec((1, Cin, D, H, W), lambda n: (n, 0, 0, 0, 0)),  # x (per sample)
        ],
        out_specs=pl.BlockSpec((1, Cout, Dout, Hout, Wout),
                               lambda n: (n, 0, 0, 0, 0)),
    )

    fn = pl.pallas_call(
        kernel,
        out_shape=jax.ShapeDtypeStruct((N, Cout, Dout, Hout, Wout), x.dtype),
        grid_spec=grid_spec,
        compiler_params=pltpu.CompilerParams(
            dimension_semantics=("parallel",),
            vmem_limit_bytes=vmem_limit,
        ),
    )
    return fn(uwT, K, b_col, x)


# ---------------------------------------------------------------------------
# Pure-JAX reference (same math, no Pallas) for correctness checking.
# ---------------------------------------------------------------------------
def _reference(x, conv_w, conv_b, scale=2, align_corners=False):
    N, Cin, D, H, W = x.shape
    Cout = conv_w.shape[0]
    y = jnp.einsum('ncdhw,oc->nodhw',
                   x.astype(jnp.float32),
                   conv_w.reshape(Cout, Cin).astype(jnp.float32))
    y = y + conv_b.reshape(1, Cout, 1, 1, 1).astype(jnp.float32)
    Ud = jnp.asarray(_upsample_matrix(D, scale, align_corners))
    Uh = jnp.asarray(_upsample_matrix(H, scale, align_corners))
    Uw = jnp.asarray(_upsample_matrix(W, scale, align_corners))
    y = jnp.einsum('pd,ncdhw->ncphw', Ud, y)
    y = jnp.einsum('qh,ncdhw->ncdqw', Uh, y)
    y = jnp.einsum('rw,ncdhw->ncdhr', Uw, y)
    return y


if __name__ == "__main__":
    key = jax.random.PRNGKey(0)
    k_x, k_w, k_b = jax.random.split(key, 3)

    # small shapes: N=2, ch_in=4, ch_out=2, D=H=W=8  (NCDHW input for Conv3d)
    N, Cin, Cout, D, H, W = 2, 4, 2, 8, 8, 8
    x = jax.random.normal(k_x, (N, Cin, D, H, W), dtype=jnp.float32)
    conv_w = 0.1 * jax.random.normal(k_w, (Cout, Cin, 1, 1, 1), dtype=jnp.float32)
    conv_b = 0.1 * jax.random.normal(k_b, (Cout,), dtype=jnp.float32)

    out = up_conv_forward(x, conv_w, conv_b, scale=2, align_corners=False)
    out = jax.block_until_ready(out)

    ref = _reference(x, conv_w, conv_b, scale=2, align_corners=False)
    assert out.shape == (N, Cout, 2 * D, 2 * H, 2 * W), out.shape
    assert jnp.allclose(out.astype(jnp.float32), ref, atol=1e-3, rtol=1e-3), \
        "mismatch vs reference"

    print("KERNEL_OK")
</pallas_src>

<mosaic_0001>
module attributes {stable_mosaic.version = 11 : i64} {
  func.func @kernel(%arg0: i32, %arg1: memref<8x16xf32, #tpu.memory_space<vmem>>, %arg2: memref<32x32xf32, #tpu.memory_space<vmem>>, %arg3: memref<32x1xf32, #tpu.memory_space<vmem>>, %arg4: memref<1x4x8x8x8xf32, #tpu.memory_space<vmem>>, %arg5: memref<1x2x16x16x16xf32, #tpu.memory_space<vmem>>) attributes {dimension_semantics = [#tpu.dimension_semantics<parallel>], iteration_bounds = array<i64: 2>, scalar_prefetch = 0 : i64, scratch_operands = 0 : i64, tpu.core_type = #tpu.core_type<tc>, window_params = [{pipeline_mode = #tpu.pipeline_mode<synchronous>, transform_indices = @transform_0, window_bounds = array<i64: 8, 16>}, {pipeline_mode = #tpu.pipeline_mode<synchronous>, transform_indices = @transform_1, window_bounds = array<i64: 32, 32>}, {pipeline_mode = #tpu.pipeline_mode<synchronous>, transform_indices = @transform_2, window_bounds = array<i64: 32, 1>}, {transform_indices = @transform_3, window_bounds = array<i64: 1, 4, 8, 8, 8>}, {transform_indices = @transform_4, window_bounds = array<i64: 1, 2, 16, 16, 16>}]} {
    %c0 = arith.constant 0 : index
    %c0_0 = arith.constant 0 : index
    %0 = vector.load %arg2[%c0, %c0_0] : memref<32x32xf32, #tpu.memory_space<vmem>>, vector<32x32xf32>
    %c0_1 = arith.constant 0 : index
    %c0_2 = arith.constant 0 : index
    %1 = vector.load %arg1[%c0_1, %c0_2] : memref<8x16xf32, #tpu.memory_space<vmem>>, vector<8x16xf32>
    %c0_3 = arith.constant 0 : index
    %c0_4 = arith.constant 0 : index
    %2 = vector.load %arg3[%c0_3, %c0_4] : memref<32x1xf32, #tpu.memory_space<vmem>>, vector<32x1xf32>
    %3 = vector.shape_cast %2 : vector<32x1xf32> to vector<32x1xf32>
    %4 = vector.broadcast %3 : vector<32x1xf32> to vector<32x16xf32>
    %c0_5 = arith.constant 0 : index
    %c0_6 = arith.constant 0 : index
    %c0_7 = arith.constant 0 : index
    %c0_8 = arith.constant 0 : index
    %c0_9 = arith.constant 0 : index
    %5 = vector.load %arg4[%c0_5, %c0_6, %c0_7, %c0_8, %c0_9] : memref<1x4x8x8x8xf32, #tpu.memory_space<vmem>>, vector<1x4x1x8x8xf32>
    %6 = vector.shape_cast %5 : vector<1x4x1x8x8xf32> to vector<4x8x8xf32>
    %7 = vector.shape_cast %6 : vector<4x8x8xf32> to vector<32x8xf32>
    %cst = arith.constant dense<0.000000e+00> : vector<32x16xf32>
    %8 = tpu.matmul %7, %1, %cst {dimension_numbers = #tpu.dot_dimension_numbers<[1], [0], [0], [1], [0, 0, 1, 1], [], []>} : vector<32x8xf32>, vector<8x16xf32>, vector<32x16xf32> -> vector<32x16xf32>
    %cst_10 = arith.constant dense<0.000000e+00> : vector<32x16xf32>
    %9 = tpu.matmul %0, %8, %cst_10 {dimension_numbers = #tpu.dot_dimension_numbers<[1], [0], [0], [1], [0, 0, 1, 1], [], []>} : vector<32x32xf32>, vector<32x16xf32>, vector<32x16xf32> -> vector<32x16xf32>
    %10 = arith.addf %9, %4 : vector<32x16xf32>
    %c0_11 = arith.constant 0 : index
    %c0_12 = arith.constant 0 : index
    %c1 = arith.constant 1 : index
    %c0_13 = arith.constant 0 : index
    %c0_14 = arith.constant 0 : index
    %11 = vector.load %arg4[%c0_11, %c0_12, %c1, %c0_13, %c0_14] : memref<1x4x8x8x8xf32, #tpu.memory_space<vmem>>, vector<1x4x1x8x8xf32>
    %12 = vector.shape_cast %11 : vector<1x4x1x8x8xf32> to vector<4x8x8xf32>
    %13 = vector.shape_cast %12 : vector<4x8x8xf32> to vector<32x8xf32>
    %cst_15 = arith.constant dense<0.000000e+00> : vector<32x16xf32>
    %14 = tpu.matmul %13, %1, %cst_15 {dimension_numbers = #tpu.dot_dimension_numbers<[1], [0], [0], [1], [0, 0, 1, 1], [], []>} : vector<32x8xf32>, vector<8x16xf32>, vector<32x16xf32> -> vector<32x16xf32>
    %cst_16 = arith.constant dense<0.000000e+00> : vector<32x16xf32>
    %15 = tpu.matmul %0, %14, %cst_16 {dimension_numbers = #tpu.dot_dimension_numbers<[1], [0], [0], [1], [0, 0, 1, 1], [], []>} : vector<32x32xf32>, vector<32x16xf32>, vector<32x16xf32> -> vector<32x16xf32>
    %16 = arith.addf %15, %4 : vector<32x16xf32>
    %c0_17 = arith.constant 0 : index
    %c0_18 = arith.constant 0 : index
    %c2 = arith.constant 2 : index
    %c0_19 = arith.constant 0 : index
    %c0_20 = arith.constant 0 : index
    %17 = vector.load %arg4[%c0_17, %c0_18, %c2, %c0_19, %c0_20] : memref<1x4x8x8x8xf32, #tpu.memory_space<vmem>>, vector<1x4x1x8x8xf32>
    %18 = vector.shape_cast %17 : vector<1x4x1x8x8xf32> to vector<4x8x8xf32>
    %19 = vector.shape_cast %18 : vector<4x8x8xf32> to vector<32x8xf32>
    %cst_21 = arith.constant dense<0.000000e+00> : vector<32x16xf32>
    %20 = tpu.matmul %19, %1, %cst_21 {dimension_numbers = #tpu.dot_dimension_numbers<[1], [0], [0], [1], [0, 0, 1, 1], [], []>} : vector<32x8xf32>, vector<8x16xf32>, vector<32x16xf32> -> vector<32x16xf32>
    %cst_22 = arith.constant dense<0.000000e+00> : vector<32x16xf32>
    %21 = tpu.matmul %0, %20, %cst_22 {dimension_numbers = #tpu.dot_dimension_numbers<[1], [0], [0], [1], [0, 0, 1, 1], [], []>} : vector<32x32xf32>, vector<32x16xf32>, vector<32x16xf32> -> vector<32x16xf32>
    %22 = arith.addf %21, %4 : vector<32x16xf32>
    %c0_23 = arith.constant 0 : index
    %c0_24 = arith.constant 0 : index
    %c3 = arith.constant 3 : index
    %c0_25 = arith.constant 0 : index
    %c0_26 = arith.constant 0 : index
    %23 = vector.load %arg4[%c0_23, %c0_24, %c3, %c0_25, %c0_26] : memref<1x4x8x8x8xf32, #tpu.memory_space<vmem>>, vector<1x4x1x8x8xf32>
    %24 = vector.shape_cast %23 : vector<1x4x1x8x8xf32> to vector<4x8x8xf32>
    %25 = vector.shape_cast %24 : vector<4x8x8xf32> to vector<32x8xf32>
    %cst_27 = arith.constant dense<0.000000e+00> : vector<32x16xf32>
    %26 = tpu.matmul %25, %1, %cst_27 {dimension_numbers = #tpu.dot_dimension_numbers<[1], [0], [0], [1], [0, 0, 1, 1], [], []>} : vector<32x8xf32>, vector<8x16xf32>, vector<32x16xf32> -> vector<32x16xf32>
    %cst_28 = arith.constant dense<0.000000e+00> : vector<32x16xf32>
    %27 = tpu.matmul %0, %26, %cst_28 {dimension_numbers = #tpu.dot_dimension_numbers<[1], [0], [0], [1], [0, 0, 1, 1], [], []>} : vector<32x32xf32>, vector<32x16xf32>, vector<32x16xf32> -> vector<32x16xf32>
    %28 = arith.addf %27, %4 : vector<32x16xf32>
    %c0_29 = arith.constant 0 : index
    %c0_30 = arith.constant 0 : index
    %c4 = arith.constant 4 : index
    %c0_31 = arith.constant 0 : index
    %c0_32 = arith.constant 0 : index
    %29 = vector.load %arg4[%c0_29, %c0_30, %c4, %c0_31, %c0_32] : memref<1x4x8x8x8xf32, #tpu.memory_space<vmem>>, vector<1x4x1x8x8xf32>
    %30 = vector.shape_cast %29 : vector<1x4x1x8x8xf32> to vector<4x8x8xf32>
    %31 = vector.shape_cast %30 : vector<4x8x8xf32> to vector<32x8xf32>
    %cst_33 = arith.constant dense<0.000000e+00> : vector<32x16xf32>
    %32 = tpu.matmul %31, %1, %cst_33 {dimension_numbers = #tpu.dot_dimension_numbers<[1], [0], [0], [1], [0, 0, 1, 1], [], []>} : vector<32x8xf32>, vector<8x16xf32>, vector<32x16xf32> -> vector<32x16xf32>
    %cst_34 = arith.constant dense<0.000000e+00> : vector<32x16xf32>
    %33 = tpu.matmul %0, %32, %cst_34 {dimension_numbers = #tpu.dot_dimension_numbers<[1], [0], [0], [1], [0, 0, 1, 1], [], []>} : vector<32x32xf32>, vector<32x16xf32>, vector<32x16xf32> -> vector<32x16xf32>
    %34 = arith.addf %33, %4 : vector<32x16xf32>
    %c0_35 = arith.constant 0 : index
    %c0_36 = arith.constant 0 : index
    %c5 = arith.constant 5 : index
    %c0_37 = arith.constant 0 : index
    %c0_38 = arith.constant 0 : index
    %35 = vector.load %arg4[%c0_35, %c0_36, %c5, %c0_37, %c0_38] : memref<1x4x8x8x8xf32, #tpu.memory_space<vmem>>, vector<1x4x1x8x8xf32>
    %36 = vector.shape_cast %35 : vector<1x4x1x8x8xf32> to vector<4x8x8xf32>
    %37 = vector.shape_cast %36 : vector<4x8x8xf32> to vector<32x8xf32>
    %cst_39 = arith.constant dense<0.000000e+00> : vector<32x16xf32>
    %38 = tpu.matmul %37, %1, %cst_39 {dimension_numbers = #tpu.dot_dimension_numbers<[1], [0], [0], [1], [0, 0, 1, 1], [], []>} : vector<32x8xf32>, vector<8x16xf32>, vector<32x16xf32> -> vector<32x16xf32>
    %cst_40 = arith.constant dense<0.000000e+00> : vector<32x16xf32>
    %39 = tpu.matmul %0, %38, %cst_40 {dimension_numbers = #tpu.dot_dimension_numbers<[1], [0], [0], [1], [0, 0, 1, 1], [], []>} : vector<32x32xf32>, vector<32x16xf32>, vector<32x16xf32> -> vector<32x16xf32>
    %40 = arith.addf %39, %4 : vector<32x16xf32>
    %c0_41 = arith.constant 0 : index
    %c0_42 = arith.constant 0 : index
    %c6 = arith.constant 6 : index
    %c0_43 = arith.constant 0 : index
    %c0_44 = arith.constant 0 : index
    %41 = vector.load %arg4[%c0_41, %c0_42, %c6, %c0_43, %c0_44] : memref<1x4x8x8x8xf32, #tpu.memory_space<vmem>>, vector<1x4x1x8x8xf32>
    %42 = vector.shape_cast %41 : vector<1x4x1x8x8xf32> to vector<4x8x8xf32>
    %43 = vector.shape_cast %42 : vector<4x8x8xf32> to vector<32x8xf32>
    %cst_45 = arith.constant dense<0.000000e+00> : vector<32x16xf32>
    %44 = tpu.matmul %43, %1, %cst_45 {dimension_numbers = #tpu.dot_dimension_numbers<[1], [0], [0], [1], [0, 0, 1, 1], [], []>} : vector<32x8xf32>, vector<8x16xf32>, vector<32x16xf32> -> vector<32x16xf32>
    %cst_46 = arith.constant dense<0.000000e+00> : vector<32x16xf32>
    %45 = tpu.matmul %0, %44, %cst_46 {dimension_numbers = #tpu.dot_dimension_numbers<[1], [0], [0], [1], [0, 0, 1, 1], [], []>} : vector<32x32xf32>, vector<32x16xf32>, vector<32x16xf32> -> vector<32x16xf32>
    %46 = arith.addf %45, %4 : vector<32x16xf32>
    %c0_47 = arith.constant 0 : index
    %c0_48 = arith.constant 0 : index
    %c7 = arith.constant 7 : index
    %c0_49 = arith.constant 0 : index
    %c0_50 = arith.constant 0 : index
    %47 = vector.load %arg4[%c0_47, %c0_48, %c7, %c0_49, %c0_50] : memref<1x4x8x8x8xf32, #tpu.memory_space<vmem>>, vector<1x4x1x8x8xf32>
    %48 = vector.shape_cast %47 : vector<1x4x1x8x8xf32> to vector<4x8x8xf32>
    %49 = vector.shape_cast %48 : vector<4x8x8xf32> to vector<32x8xf32>
    %cst_51 = arith.constant dense<0.000000e+00> : vector<32x16xf32>
    %50 = tpu.matmul %49, %1, %cst_51 {dimension_numbers = #tpu.dot_dimension_numbers<[1], [0], [0], [1], [0, 0, 1, 1], [], []>} : vector<32x8xf32>, vector<8x16xf32>, vector<32x16xf32> -> vector<32x16xf32>
    %cst_52 = arith.constant dense<0.000000e+00> : vector<32x16xf32>
    %51 = tpu.matmul %0, %50, %cst_52 {dimension_numbers = #tpu.dot_dimension_numbers<[1], [0], [0], [1], [0, 0, 1, 1], [], []>} : vector<32x32xf32>, vector<32x16xf32>, vector<32x16xf32> -> vector<32x16xf32>
    %52 = arith.addf %51, %4 : vector<32x16xf32>
    %53 = vector.shape_cast %10 : vector<32x16xf32> to vector<2x16x16xf32>
    %c0_53 = arith.constant 0 : index
    %c0_54 = arith.constant 0 : index
    %c0_55 = arith.constant 0 : index
    %c0_56 = arith.constant 0 : index
    %c0_57 = arith.constant 0 : index
    %54 = vector.load %arg5[%c0_53, %c0_54, %c0_55, %c0_56, %c0_57] : memref<1x2x16x16x16xf32, #tpu.memory_space<vmem>>, vector<1x2x1x16x16xf32>
    %55 = vector.shape_cast %54 : vector<1x2x1x16x16xf32> to vector<2x16x16xf32>
    %56 = vector.shape_cast %53 : vector<2x16x16xf32> to vector<1x2x1x16x16xf32>
    tpu.vector_store %arg5[%c0_53, %c0_54, %c0_55, %c0_56, %c0_57], %56 {strides = array<i32>} : memref<1x2x16x16x16xf32, #tpu.memory_space<vmem>>, vector<1x2x1x16x16xf32>,
    %cst_58 = arith.constant 7.500000e-01 : f32
    %57 = vector.broadcast %cst_58 : f32 to vector<32x16xf32>
    %58 = arith.mulf %57, %10 : vector<32x16xf32>
    %cst_59 = arith.constant 2.500000e-01 : f32
    %59 = vector.broadcast %cst_59 : f32 to vector<32x16xf32>
    %60 = arith.mulf %59, %16 : vector<32x16xf32>
    %61 = arith.addf %58, %60 : vector<32x16xf32>
    %62 = vector.shape_cast %61 : vector<32x16xf32> to vector<2x16x16xf32>
    %c0_60 = arith.constant 0 : index
    %c0_61 = arith.constant 0 : index
    %c1_62 = arith.constant 1 : index
    %c0_63 = arith.constant 0 : index
    %c0_64 = arith.constant 0 : index
    %63 = vector.load %arg5[%c0_60, %c0_61, %c1_62, %c0_63, %c0_64] : memref<1x2x16x16x16xf32, #tpu.memory_space<vmem>>, vector<1x2x1x16x16xf32>
    %64 = vector.shape_cast %63 : vector<1x2x1x16x16xf32> to vector<2x16x16xf32>
    %65 = vector.shape_cast %62 : vector<2x16x16xf32> to vector<1x2x1x16x16xf32>
    tpu.vector_store %arg5[%c0_60, %c0_61, %c1_62, %c0_63, %c0_64], %65 {strides = array<i32>} : memref<1x2x16x16x16xf32, #tpu.memory_space<vmem>>, vector<1x2x1x16x16xf32>,
    %cst_65 = arith.constant 2.500000e-01 : f32
    %66 = vector.broadcast %cst_65 : f32 to vector<32x16xf32>
    %67 = arith.mulf %66, %10 : vector<32x16xf32>
    %cst_66 = arith.constant 7.500000e-01 : f32
    %68 = vector.broadcast %cst_66 : f32 to vector<32x16xf32>
    %69 = arith.mulf %68, %16 : vector<32x16xf32>
    %70 = arith.addf %67, %69 : vector<32x16xf32>
    %71 = vector.shape_cast %70 : vector<32x16xf32> to vector<2x16x16xf32>
    %c0_67 = arith.constant 0 : index
    %c0_68 = arith.constant 0 : index
    %c2_69 = arith.constant 2 : index
    %c0_70 = arith.constant 0 : index
    %c0_71 = arith.constant 0 : index
    %72 = vector.load %arg5[%c0_67, %c0_68, %c2_69, %c0_70, %c0_71] : memref<1x2x16x16x16xf32, #tpu.memory_space<vmem>>, vector<1x2x1x16x16xf32>
    %73 = vector.shape_cast %72 : vector<1x2x1x16x16xf32> to vector<2x16x16xf32>
    %74 = vector.shape_cast %71 : vector<2x16x16xf32> to vector<1x2x1x16x16xf32>
    tpu.vector_store %arg5[%c0_67, %c0_68, %c2_69, %c0_70, %c0_71], %74 {strides = array<i32>} : memref<1x2x16x16x16xf32, #tpu.memory_space<vmem>>, vector<1x2x1x16x16xf32>,
    %cst_72 = arith.constant 7.500000e-01 : f32
    %75 = vector.broadcast %cst_72 : f32 to vector<32x16xf32>
    %76 = arith.mulf %75, %16 : vector<32x16xf32>
    %cst_73 = arith.constant 2.500000e-01 : f32
    %77 = vector.broadcast %cst_73 : f32 to vector<32x16xf32>
    %78 = arith.mulf %77, %22 : vector<32x16xf32>
    %79 = arith.addf %76, %78 : vector<32x16xf32>
    %80 = vector.shape_cast %79 : vector<32x16xf32> to vector<2x16x16xf32>
    %c0_74 = arith.constant 0 : index
    %c0_75 = arith.constant 0 : index
    %c3_76 = arith.constant 3 : index
    %c0_77 = arith.constant 0 : index
    %c0_78 = arith.constant 0 : index
    %81 = vector.load %arg5[%c0_74, %c0_75, %c3_76, %c0_77, %c0_78] : memref<1x2x16x16x16xf32, #tpu.memory_space<vmem>>, vector<1x2x1x16x16xf32>
    %82 = vector.shape_cast %81 : vector<1x2x1x16x16xf32> to vector<2x16x16xf32>
    %83 = vector.shape_cast %80 : vector<2x16x16xf32> to vector<1x2x1x16x16xf32>
    tpu.vector_store %arg5[%c0_74, %c0_75, %c3_76, %c0_77, %c0_78], %83 {strides = array<i32>} : memref<1x2x16x16x16xf32, #tpu.memory_space<vmem>>, vector<1x2x1x16x16xf32>,
    %cst_79 = arith.constant 2.500000e-01 : f32
    %84 = vector.broadcast %cst_79 : f32 to vector<32x16xf32>
    %85 = arith.mulf %84, %16 : vector<32x16xf32>
    %cst_80 = arith.constant 7.500000e-01 : f32
    %86 = vector.broadcast %cst_80 : f32 to vector<32x16xf32>
    %87 = arith.mulf %86, %22 : vector<32x16xf32>
    %88 = arith.addf %85, %87 : vector<32x16xf32>
    %89 = vector.shape_cast %88 : vector<32x16xf32> to vector<2x16x16xf32>
    %c0_81 = arith.constant 0 : index
    %c0_82 = arith.constant 0 : index
    %c4_83 = arith.constant 4 : index
    %c0_84 = arith.constant 0 : index
    %c0_85 = arith.constant 0 : index
    %90 = vector.load %arg5[%c0_81, %c0_82, %c4_83, %c0_84, %c0_85] : memref<1x2x16x16x16xf32, #tpu.memory_space<vmem>>, vector<1x2x1x16x16xf32>
    %91 = vector.shape_cast %90 : vector<1x2x1x16x16xf32> to vector<2x16x16xf32>
    %92 = vector.shape_cast %89 : vector<2x16x16xf32> to vector<1x2x1x16x16xf32>
    tpu.vector_store %arg5[%c0_81, %c0_82, %c4_83, %c0_84, %c0_85], %92 {strides = array<i32>} : memref<1x2x16x16x16xf32, #tpu.memory_space<vmem>>, vector<1x2x1x16x16xf32>,
    %cst_86 = arith.constant 7.500000e-01 : f32
    %93 = vector.broadcast %cst_86 : f32 to vector<32x16xf32>
    %94 = arith.mulf %93, %22 : vector<32x16xf32>
    %cst_87 = arith.constant 2.500000e-01 : f32
    %95 = vector.broadcast %cst_87 : f32 to vector<32x16xf32>
    %96 = arith.mulf %95, %28 : vector<32x16xf32>
    %97 = arith.addf %94, %96 : vector<32x16xf32>
    %98 = vector.shape_cast %97 : vector<32x16xf32> to vector<2x16x16xf32>
    %c0_88 = arith.constant 0 : index
    %c0_89 = arith.constant 0 : index
    %c5_90 = arith.constant 5 : index
    %c0_91 = arith.constant 0 : index
    %c0_92 = arith.constant 0 : index
    %99 = vector.load %arg5[%c0_88, %c0_89, %c5_90, %c0_91, %c0_92] : memref<1x2x16x16x16xf32, #tpu.memory_space<vmem>>, vector<1x2x1x16x16xf32>
    %100 = vector.shape_cast %99 : vector<1x2x1x16x16xf32> to vector<2x16x16xf32>
    %101 = vector.shape_cast %98 : vector<2x16x16xf32> to vector<1x2x1x16x16xf32>
    tpu.vector_store %arg5[%c0_88, %c0_89, %c5_90, %c0_91, %c0_92], %101 {strides = array<i32>} : memref<1x2x16x16x16xf32, #tpu.memory_space<vmem>>, vector<1x2x1x16x16xf32>,
    %cst_93 = arith.constant 2.500000e-01 : f32
    %102 = vector.broadcast %cst_93 : f32 to vector<32x16xf32>
    %103 = arith.mulf %102, %22 : vector<32x16xf32>
    %cst_94 = arith.constant 7.500000e-01 : f32
    %104 = vector.broadcast %cst_94 : f32 to vector<32x16xf32>
    %105 = arith.mulf %104, %28 : vector<32x16xf32>
    %106 = arith.addf %103, %105 : vector<32x16xf32>
    %107 = vector.shape_cast %106 : vector<32x16xf32> to vector<2x16x16xf32>
    %c0_95 = arith.constant 0 : index
    %c0_96 = arith.constant 0 : index
    %c6_97 = arith.constant 6 : index
    %c0_98 = arith.constant 0 : index
    %c0_99 = arith.constant 0 : index
    %108 = vector.load %arg5[%c0_95, %c0_96, %c6_97, %c0_98, %c0_99] : memref<1x2x16x16x16xf32, #tpu.memory_space<vmem>>, vector<1x2x1x16x16xf32>
    %109 = vector.shape_cast %108 : vector<1x2x1x16x16xf32> to vector<2x16x16xf32>
    %110 = vector.shape_cast %107 : vector<2x16x16xf32> to vector<1x2x1x16x16xf32>
    tpu.vector_store %arg5[%c0_95, %c0_96, %c6_97, %c0_98, %c0_99], %110 {strides = array<i32>} : memref<1x2x16x16x16xf32, #tpu.memory_space<vmem>>, vector<1x2x1x16x16xf32>,
    %cst_100 = arith.constant 7.500000e-01 : f32
    %111 = vector.broadcast %cst_100 : f32 to vector<32x16xf32>
    %112 = arith.mulf %111, %28 : vector<32x16xf32>
    %cst_101 = arith.constant 2.500000e-01 : f32
    %113 = vector.broadcast %cst_101 : f32 to vector<32x16xf32>
    %114 = arith.mulf %113, %34 : vector<32x16xf32>
    %115 = arith.addf %112, %114 : vector<32x16xf32>
    %116 = vector.shape_cast %115 : vector<32x16xf32> to vector<2x16x16xf32>
    %c0_102 = arith.constant 0 : index
    %c0_103 = arith.constant 0 : index
    %c7_104 = arith.constant 7 : index
    %c0_105 = arith.constant 0 : index
    %c0_106 = arith.constant 0 : index
    %117 = vector.load %arg5[%c0_102, %c0_103, %c7_104, %c0_105, %c0_106] : memref<1x2x16x16x16xf32, #tpu.memory_space<vmem>>, vector<1x2x1x16x16xf32>
    %118 = vector.shape_cast %117 : vector<1x2x1x16x16xf32> to vector<2x16x16xf32>
    %119 = vector.shape_cast %116 : vector<2x16x16xf32> to vector<1x2x1x16x16xf32>
    tpu.vector_store %arg5[%c0_102, %c0_103, %c7_104, %c0_105, %c0_106], %119 {strides = array<i32>} : memref<1x2x16x16x16xf32, #tpu.memory_space<vmem>>, vector<1x2x1x16x16xf32>,
    %cst_107 = arith.constant 2.500000e-01 : f32
    %120 = vector.broadcast %cst_107 : f32 to vector<32x16xf32>
    %121 = arith.mulf %120, %28 : vector<32x16xf32>
    %cst_108 = arith.constant 7.500000e-01 : f32
    %122 = vector.broadcast %cst_108 : f32 to vector<32x16xf32>
    %123 = arith.mulf %122, %34 : vector<32x16xf32>
    %124 = arith.addf %121, %123 : vector<32x16xf32>
    %125 = vector.shape_cast %124 : vector<32x16xf32> to vector<2x16x16xf32>
    %c0_109 = arith.constant 0 : index
    %c0_110 = arith.constant 0 : index
    %c8 = arith.constant 8 : index
    %c0_111 = arith.constant 0 : index
    %c0_112 = arith.constant 0 : index
    %126 = vector.load %arg5[%c0_109, %c0_110, %c8, %c0_111, %c0_112] : memref<1x2x16x16x16xf32, #tpu.memory_space<vmem>>, vector<1x2x1x16x16xf32>
    %127 = vector.shape_cast %126 : vector<1x2x1x16x16xf32> to vector<2x16x16xf32>
    %128 = vector.shape_cast %125 : vector<2x16x16xf32> to vector<1x2x1x16x16xf32>
    tpu.vector_store %arg5[%c0_109, %c0_110, %c8, %c0_111, %c0_112], %128 {strides = array<i32>} : memref<1x2x16x16x16xf32, #tpu.memory_space<vmem>>, vector<1x2x1x16x16xf32>,
    %cst_113 = arith.constant 7.500000e-01 : f32
    %129 = vector.broadcast %cst_113 : f32 to vector<32x16xf32>
    %130 = arith.mulf %129, %34 : vector<32x16xf32>
    %cst_114 = arith.constant 2.500000e-01 : f32
    %131 = vector.broadcast %cst_114 : f32 to vector<32x16xf32>
    %132 = arith.mulf %131, %40 : vector<32x16xf32>
    %133 = arith.addf %130, %132 : vector<32x16xf32>
    %134 = vector.shape_cast %133 : vector<32x16xf32> to vector<2x16x16xf32>
    %c0_115 = arith.constant 0 : index
    %c0_116 = arith.constant 0 : index
    %c9 = arith.constant 9 : index
    %c0_117 = arith.constant 0 : index
    %c0_118 = arith.constant 0 : index
    %135 = vector.load %arg5[%c0_115, %c0_116, %c9, %c0_117, %c0_118] : memref<1x2x16x16x16xf32, #tpu.memory_space<vmem>>, vector<1x2x1x16x16xf32>
    %136 = vector.shape_cast %135 : vector<1x2x1x16x16xf32> to vector<2x16x16xf32>
    %137 = vector.shape_cast %134 : vector<2x16x16xf32> to vector<1x2x1x16x16xf32>
    tpu.vector_store %arg5[%c0_115, %c0_116, %c9, %c0_117, %c0_118], %137 {strides = array<i32>} : memref<1x2x16x16x16xf32, #tpu.memory_space<vmem>>, vector<1x2x1x16x16xf32>,
    %cst_119 = arith.constant 2.500000e-01 : f32
    %138 = vector.broadcast %cst_119 : f32 to vector<32x16xf32>
    %139 = arith.mulf %138, %34 : vector<32x16xf32>
    %cst_120 = arith.constant 7.500000e-01 : f32
    %140 = vector.broadcast %cst_120 : f32 to vector<32x16xf32>
    %141 = arith.mulf %140, %40 : vector<32x16xf32>
    %142 = arith.addf %139, %141 : vector<32x16xf32>
    %143 = vector.shape_cast %142 : vector<32x16xf32> to vector<2x16x16xf32>
    %c0_121 = arith.constant 0 : index
    %c0_122 = arith.constant 0 : index
    %c10 = arith.constant 10 : index
    %c0_123 = arith.constant 0 : index
    %c0_124 = arith.constant 0 : index
    %144 = vector.load %arg5[%c0_121, %c0_122, %c10, %c0_123, %c0_124] : memref<1x2x16x16x16xf32, #tpu.memory_space<vmem>>, vector<1x2x1x16x16xf32>
    %145 = vector.shape_cast %144 : vector<1x2x1x16x16xf32> to vector<2x16x16xf32>
    %146 = vector.shape_cast %143 : vector<2x16x16xf32> to vector<1x2x1x16x16xf32>
    tpu.vector_store %arg5[%c0_121, %c0_122, %c10, %c0_123, %c0_124], %146 {strides = array<i32>} : memref<1x2x16x16x16xf32, #tpu.memory_space<vmem>>, vector<1x2x1x16x16xf32>,
    %cst_125 = arith.constant 7.500000e-01 : f32
    %147 = vector.broadcast %cst_125 : f32 to vector<32x16xf32>
    %148 = arith.mulf %147, %40 : vector<32x16xf32>
    %cst_126 = arith.constant 2.500000e-01 : f32
    %149 = vector.broadcast %cst_126 : f32 to vector<32x16xf32>
    %150 = arith.mulf %149, %46 : vector<32x16xf32>
    %151 = arith.addf %148, %150 : vector<32x16xf32>
    %152 = vector.shape_cast %151 : vector<32x16xf32> to vector<2x16x16xf32>
    %c0_127 = arith.constant 0 : index
    %c0_128 = arith.constant 0 : index
    %c11 = arith.constant 11 : index
    %c0_129 = arith.constant 0 : index
    %c0_130 = arith.constant 0 : index
    %153 = vector.load %arg5[%c0_127, %c0_128, %c11, %c0_129, %c0_130] : memref<1x2x16x16x16xf32, #tpu.memory_space<vmem>>, vector<1x2x1x16x16xf32>
    %154 = vector.shape_cast %153 : vector<1x2x1x16x16xf32> to vector<2x16x16xf32>
    %155 = vector.shape_cast %152 : vector<2x16x16xf32> to vector<1x2x1x16x16xf32>
    tpu.vector_store %arg5[%c0_127, %c0_128, %c11, %c0_129, %c0_130], %155 {strides = array<i32>} : memref<1x2x16x16x16xf32, #tpu.memory_space<vmem>>, vector<1x2x1x16x16xf32>,
    %cst_131 = arith.constant 2.500000e-01 : f32
    %156 = vector.broadcast %cst_131 : f32 to vector<32x16xf32>
    %157 = arith.mulf %156, %40 : vector<32x16xf32>
    %cst_132 = arith.constant 7.500000e-01 : f32
    %158 = vector.broadcast %cst_132 : f32 to vector<32x16xf32>
    %159 = arith.mulf %158, %46 : vector<32x16xf32>
    %160 = arith.addf %157, %159 : vector<32x16xf32>
    %161 = vector.shape_cast %160 : vector<32x16xf32> to vector<2x16x16xf32>
    %c0_133 = arith.constant 0 : index
    %c0_134 = arith.constant 0 : index
    %c12 = arith.constant 12 : index
    %c0_135 = arith.constant 0 : index
    %c0_136 = arith.constant 0 : index
    %162 = vector.load %arg5[%c0_133, %c0_134, %c12, %c0_135, %c0_136] : memref<1x2x16x16x16xf32, #tpu.memory_space<vmem>>, vector<1x2x1x16x16xf32>
    %163 = vector.shape_cast %162 : vector<1x2x1x16x16xf32> to vector<2x16x16xf32>
    %164 = vector.shape_cast %161 : vector<2x16x16xf32> to vector<1x2x1x16x16xf32>
    tpu.vector_store %arg5[%c0_133, %c0_134, %c12, %c0_135, %c0_136], %164 {strides = array<i32>} : memref<1x2x16x16x16xf32, #tpu.memory_space<vmem>>, vector<1x2x1x16x16xf32>,
    %cst_137 = arith.constant 7.500000e-01 : f32
    %165 = vector.broadcast %cst_137 : f32 to vector<32x16xf32>
    %166 = arith.mulf %165, %46 : vector<32x16xf32>
    %cst_138 = arith.constant 2.500000e-01 : f32
    %167 = vector.broadcast %cst_138 : f32 to vector<32x16xf32>
    %168 = arith.mulf %167, %52 : vector<32x16xf32>
    %169 = arith.addf %166, %168 : vector<32x16xf32>
    %170 = vector.shape_cast %169 : vector<32x16xf32> to vector<2x16x16xf32>
    %c0_139 = arith.constant 0 : index
    %c0_140 = arith.constant 0 : index
    %c13 = arith.constant 13 : index
    %c0_141 = arith.constant 0 : index
    %c0_142 = arith.constant 0 : index
    %171 = vector.load %arg5[%c0_139, %c0_140, %c13, %c0_141, %c0_142] : memref<1x2x16x16x16xf32, #tpu.memory_space<vmem>>, vector<1x2x1x16x16xf32>
    %172 = vector.shape_cast %171 : vector<1x2x1x16x16xf32> to vector<2x16x16xf32>
    %173 = vector.shape_cast %170 : vector<2x16x16xf32> to vector<1x2x1x16x16xf32>
    tpu.vector_store %arg5[%c0_139, %c0_140, %c13, %c0_141, %c0_142], %173 {strides = array<i32>} : memref<1x2x16x16x16xf32, #tpu.memory_space<vmem>>, vector<1x2x1x16x16xf32>,
    %cst_143 = arith.constant 2.500000e-01 : f32
    %174 = vector.broadcast %cst_143 : f32 to vector<32x16xf32>
    %175 = arith.mulf %174, %46 : vector<32x16xf32>
    %cst_144 = arith.constant 7.500000e-01 : f32
    %176 = vector.broadcast %cst_144 : f32 to vector<32x16xf32>
    %177 = arith.mulf %176, %52 : vector<32x16xf32>
    %178 = arith.addf %175, %177 : vector<32x16xf32>
    %179 = vector.shape_cast %178 : vector<32x16xf32> to vector<2x16x16xf32>
    %c0_145 = arith.constant 0 : index
    %c0_146 = arith.constant 0 : index
    %c14 = arith.constant 14 : index
    %c0_147 = arith.constant 0 : index
    %c0_148 = arith.constant 0 : index
    %180 = vector.load %arg5[%c0_145, %c0_146, %c14, %c0_147, %c0_148] : memref<1x2x16x16x16xf32, #tpu.memory_space<vmem>>, vector<1x2x1x16x16xf32>
    %181 = vector.shape_cast %180 : vector<1x2x1x16x16xf32> to vector<2x16x16xf32>
    %182 = vector.shape_cast %179 : vector<2x16x16xf32> to vector<1x2x1x16x16xf32>
    tpu.vector_store %arg5[%c0_145, %c0_146, %c14, %c0_147, %c0_148], %182 {strides = array<i32>} : memref<1x2x16x16x16xf32, #tpu.memory_space<vmem>>, vector<1x2x1x16x16xf32>,
    %183 = vector.shape_cast %52 : vector<32x16xf32> to vector<2x16x16xf32>
    %c0_149 = arith.constant 0 : index
    %c0_150 = arith.constant 0 : index
    %c15 = arith.constant 15 : index
    %c0_151 = arith.constant 0 : index
    %c0_152 = arith.constant 0 : index
    %184 = vector.load %arg5[%c0_149, %c0_150, %c15, %c0_151, %c0_152] : memref<1x2x16x16x16xf32, #tpu.memory_space<vmem>>, vector<1x2x1x16x16xf32>
    %185 = vector.shape_cast %184 : vector<1x2x1x16x16xf32> to vector<2x16x16xf32>
    %186 = vector.shape_cast %183 : vector<2x16x16xf32> to vector<1x2x1x16x16xf32>
    tpu.vector_store %arg5[%c0_149, %c0_150, %c15, %c0_151, %c0_152], %186 {strides = array<i32>} : memref<1x2x16x16x16xf32, #tpu.memory_space<vmem>>, vector<1x2x1x16x16xf32>,
    return
  }
  func.func @transform_0(%arg0: i32) -> (i32, i32) {
    %c0_i32 = arith.constant 0 : i32
    %c0_i32_0 = arith.constant 0 : i32
    %c0_i32_1 = arith.constant 0 : i32
    return %c0_i32, %c0_i32_0 : i32, i32
  }
  func.func @transform_1(%arg0: i32) -> (i32, i32) {
    %c0_i32 = arith.constant 0 : i32
    %c0_i32_0 = arith.constant 0 : i32
    %c0_i32_1 = arith.constant 0 : i32
    return %c0_i32, %c0_i32_0 : i32, i32
  }
  func.func @transform_2(%arg0: i32) -> (i32, i32) {
    %c0_i32 = arith.constant 0 : i32
    %c0_i32_0 = arith.constant 0 : i32
    %c0_i32_1 = arith.constant 0 : i32
    return %c0_i32, %c0_i32_0 : i32, i32
  }
  func.func @transform_3(%arg0: i32) -> (i32, i32, i32, i32, i32) {
    %c0_i32 = arith.constant 0 : i32
    %c0_i32_0 = arith.constant 0 : i32
    %c0_i32_1 = arith.constant 0 : i32
    %c0_i32_2 = arith.constant 0 : i32
    %c0_i32_3 = arith.constant 0 : i32
    return %arg0, %c0_i32, %c0_i32_0, %c0_i32_1, %c0_i32_2 : i32, i32, i32, i32, i32
  }
  func.func @transform_4(%arg0: i32) -> (i32, i32, i32, i32, i32) {
    %c0_i32 = arith.constant 0 : i32
    %c0_i32_0 = arith.constant 0 : i32
    %c0_i32_1 = arith.constant 0 : i32
    %c0_i32_2 = arith.constant 0 : i32
    %c0_i32_3 = arith.constant 0 : i32
    return %arg0, %c0_i32, %c0_i32_0, %c0_i32_1, %c0_i32_2 : i32, i32, i32, i32, i32
  }
}

</mosaic_0001>

<bundles_post_ra>
// kernel: tpu_custom_call.1
= control target key start
LH: loop header
LB: loop body
LE: loop exit
PB: predicated region body
PF: predicated region fallthrough
CT: control target
= control target key end

     0   :  { %s2135_s0 = inlined_call_operand.hbm [shape: f32[8,16], index: 0, kind: input, shape index: {}]   ;;  %s2136_s1 = inlined_call_operand.vmem [shape: f32[32,32], index: 1, kind: input, shape index: {}]   ;;  %s2137_s2 = inlined_call_operand.vmem [shape: f32[32,1], index: 2, kind: input, shape index: {}]   ;;  %s2138_s3 = inlined_call_operand.hbm [shape: f32[2,4,8,8,8], index: 3, kind: input, shape index: {}]   ;;  %s2139_s4 = inlined_call_operand.hbm [shape: f32[2,2,16,16,16], index: 4, kind: output, shape index: {}]  }
   0x1   :  { %2140 = sst [smem:[#allocation11_spill]] %s2135_s0 }
   0x2   :  { %9 = vsyncpa [#allocation3], 0 }
   0x3   :  { %10 = vsyncpa [#allocation6], 0 }
   0x4   :  { %12 = vsyncpa [#allocation6 + $0x1], 0 }
   0x5   :  { %13 = vsyncpa [#allocation4], 0 }
   0x6   :  { %15 = vsyncpa [#allocation4 + $0x1], 0  ;;  %s1573_s15 = smov 0   ;;  %s1575_s16 = smov 0  }
   0x7   :  { %s1577_s17 = smov 0   ;;  %s1579_s18 = smov 0  }
   0x8 LB: > { %s1594_s19 = sadd.s32 4294967295, %s1540_s18   ;;  %s1176_s20 = sadd.s32 4294967294, %s1540_s18   ;;  %s1540_s18 = sphi %s1579_s18, %s2152_s18   ;;  %s1536_s17 = sphi %s1577_s17, %s2151_s17   ;;  %s1532_s16 = sphi %s1575_s16, %s2150_s16   ;;  %s1528_s15 = sphi %s1573_s15, %s2149_s15  }
   0x9   : > { %s1598_s21 = sadd.s32 1, %s1540_s18   ;;  %s91_s22 = sadd.s32 1, %s1536_s17 }
   0xa   : > { %s88_s23 = ssub.s32 %s1540_s18, %s1598_s21  ;;  %p98_p0 = scmp.ne.s32.totalorder %s1536_s17, %s1532_s16 }
   0xb   : > { %p89_p1 = scmp.eq.s32.totalorder %s88_s23, 0  ;;  %p99_p2 = scmp.eq.s32.totalorder %s1540_s18, 0 }
   0xc   : > { %p104_p3 = scmp.ne.s32.totalorder %s1532_s16, %s1528_s15  ;;  %p105_p4 = scmp.eq.s32.totalorder %s1594_s19, 0 }
   0xd   : > { %s1610_s24 = scalar_select %p89_p1, %s1536_s17, %s91_s22  }
   0xe   : > { %p1612_p5 = por %p99_p2, %p98_p0  ;;  %p1618_p6 = por %p105_p4, %p104_p3 }
   0xf   : > { %p128_p7 = scmp.eq.s32.totalorder %s1594_s19, 1  ;;  %p134_p8 = scmp.eq.s32.totalorder %s1176_s20, 1 }
  0x10   : > { %p1177_p9 = scmp.ge.s32.totalorder %s1540_s18, 1  ;;  %p141_p10 = scmp.lt.s32.totalorder %s1540_s18, 3 }
  0x11   : > { %p1625_p11 = por %p128_p7, %p98_p0  ;;  %p1629_p12 = por %p134_p8, %p104_p3 }
  0x12   : > { %p1633_p13 = pnand %p1177_p9, %p141_p10  ;;  %s2146_s0 = sld [smem:[#allocation11_spill]] }
  0x13   : > { %s1542_s7 = smov [#allocation2]   ;;  %p1367_p3 = scmp.lt.s32.totalorder %s1540_s18, 2 }
  0x14   : > { %p1354_p1 = pneg %p1633_p13  ;;  %s155_s8 = sshll.u32 %s1542_s7, 4  ;;  %s156_s8 = int_to_ptr.vmem [resolvable:$true] %s155_s8 }
  0x15   : > { %s172_s9 = sand.u32 1, %s1536_s17   ;;  %p1649_p7 = pnand %p1367_p3, %p1612_p5 }
  0x16   : > { %p1355_p2 = pnand %p1354_p1, %p105_p4  ;;  %s1180_s11 = sshll.u32 %s172_s9, 8 }
  0x17   : > { %s1344_s12 = sshll.u32 %s1540_s18, 8  ;;  %s176_s23 = scalar_lea.vmem [#allocation5], %s1180_s11 }
  0x18   : > { %s153_s6 = sshll.u32 %s2146_s0, 4  ;;  %s181_s20 = scalar_lea.hbm %s2138_s3, %s1344_s12  ;;  %s154_s6 = int_to_ptr.hbm [resolvable:$true] %s153_s6 }
  0x19   : > { %1357 = dma.hbm_to_vmem [thread:$0]  (!%p1355_p2), %s154_s6, 128, %s156_s8, [#allocation3]  }
  0x1a   : > { %s182_s22 = sshll.u32 %s181_s20, 4  ;;  %s184_s30 = sshll.u32 %s176_s23, 4  ;;  %s183_s22 = int_to_ptr.hbm [resolvable:$true] %s182_s22  ;;  %s185_s30 = int_to_ptr.vmem [resolvable:$true] %s184_s30 }
  0x1b   : > { %s173_s5 = scalar_lea.sflag [#allocation6], %s172_s9  ;;  %s1440_s7 = sshra.s32 %s183_s22, 4  ;;  %s1441_s7 = int_to_ptr.hbm [resolvable:$true] %s1440_s7 }
  0x1c   : > { %s1442_s25 = scalar_lea.hbm %s1441_s7, 256  ;;  %p1444_p8 = pneg %p1649_p7 }
  0x1d   : > { %p1443_p5 = scmp.ne.s32.totalorder %s1441_s7, %s1442_s25  ;;  %s1447_s0 = scalar_lea.hbm %s2138_s3, 512 }
  0x1e   : > { %p1448_p1 = scmp.lt.s32.totalorder %s1441_s7, %s2138_s3  ;;  %p1449_p2 = scmp.lt.s32.totalorder %s1447_s0, %s1442_s25 }
  0x1f   : > { %p1445_p9 = pnand %p1444_p8, %p1443_p5 }
  0x20   : > { %p1450_p3 = por %p1449_p2, %p1448_p1 }
  0x21   : > { %p1446_p10 = pneg %p1445_p9 }
  0x23   : > { %p1451_p0 = pnand %p1450_p3, %p1446_p10 }
  0x25   : > { %1454 = shalt.err (!%p1451_p0)
}
  0x26   : > { %s1543_s9 = smov 128   ;;  %s1544_s11 = smov 8  }
  0x27   : > { %1361 = dma.hbm_to_vmem [thread:$0]  (!%p1649_p7), %s183_s22, 4096, %s185_s30, %s173_s5, %s1543_s9, %s1543_s9, %s1544_s11  }
  0x28   : > { %196 = sbr.rel (%p1633_p13) target bundleno = 629 (0x275), region = 36 }
  0x2d   : > { %1515 = dma.done.wait (%p105_p4), [#allocation3], 128  }
  0x2e   : > { %1517 = vsyncadd (%p105_p4), [#allocation3], 4294967168  ;;  %s1674_s0 = sand.u32 1, %s1532_s16  }
  0x2f   : > { %s1185_s14 = sshll.u32 %s1674_s0, 8  ;;  %s204_s20 = scalar_lea.sflag [#allocation6], %s1674_s0 }
  0x30   : > { %s1678_s23 = scalar_lea.vmem [#allocation5], %s1185_s14 }
  0x31   : > { %1519 = dma.done.wait (%p1618_p6), %s204_s20, 4096  }
  0x32   : > { %1521 = vsyncadd (%p1618_p6), %s204_s20, 4294963200  ;;  %vm266_vm0 = vcmask 64512   ;;  %v1684_v0 = vld [vmem:[#allocation2] sm:$0xff]  ;;  %v262_v1 = vld [vmem:[%s1678_s23] sm:$0xff]  ;;  %v1545_v15 = vmov 0   ;;  %vm308_vm1 = vcmask 261120  }
  0x33   : > { %v1195_v2 = vld [vmem:[%s1678_s23 + $0x8] sm:$0xff]  ;;  %294 = vmatpush.msra.mxu0 %v1684_v0  ;;  %382 = vmatpush.msra.mxu2 %v1684_v0  ;;  %v263_v3 = vld [vmem:[%s1678_s23 + $0x40] sm:$0xff]  ;;  %v1207_v9 = vld [vmem:[%s1678_s23 + $0x10] sm:$0xff]  ;;  %s1186_s26 = sshll.u32 %s1674_s0, 9  ;;  %vm875_vm2 = vcmask 130048   ;;  %s1490_s12 = scalar_lea.hbm %s2139_s4, 1024 }
  0x34   : > { %1187 = vmatmul.msk.f32.vlgmr.msra.gmra.mxu0 %vm266_vm0, %v262_v1  ;;  %1199 = vmatmul.msk.f32.vlgmr.msra.gmra.mxu2 %vm266_vm0, %v1195_v2  ;;  %v1196_v4 = vld [vmem:[%s1678_s23 + $0x48] sm:$0xff]  ;;  %v264_v5 = vld [vmem:[%s1678_s23 + $0x80] sm:$0xff]  ;;  %v1208_v12 = vld [vmem:[%s1678_s23 + $0x50] sm:$0xff]  ;;  %s1812_s29 = scalar_lea.vmem [#allocation7], %s1186_s26 }
  0x35   : > { %457 = vmatpush.msrb.mxu0 %v1684_v0  ;;  %v1197_v6 = vld [vmem:[%s1678_s23 + $0x88] sm:$0xff]  ;;  %v265_v7 = vld [vmem:[%s1678_s23 + $0xc0] sm:$0xff]  ;;  %v238_v14 = vld [vmem:[%s2137_s2] sm:$0xff]  ;;  %1408 = vset.pattern.permute.xlu0 %v1545_v15  ;;  %s1088_s5 = sshll.u32 %s1812_s29, 4  ;;  %s1089_s5 = int_to_ptr.vmem [resolvable:$true] %s1088_s5 }
  0x36   : > { %v1198_v8 = vld [vmem:[%s1678_s23 + $0xc8] sm:$0xff]  ;;  %1409 = vset.pattern.permute.xlu1 %v1545_v15  ;;  %244 = vperm.xlu0 %1408, %v238_v14   ;;  %v1209_v17 = vld [vmem:[%s1678_s23 + $0x90] sm:$0xff]  ;;  %v239_v19 = vld [vmem:[%s2137_s2 + $0x8] sm:$0xff] }
  0x37   : > { %607 = vmatpush.msra.mxu0 %v1684_v0  ;;  %v1210_v21 = vld [vmem:[%s1678_s23 + $0xd0] sm:$0xff]  ;;  %v240_v23 = vld [vmem:[%s2137_s2 + $0x10] sm:$0xff]  ;;  %v1727_v24 = vld [vmem:[%s2136_s1] sm:$0xff] }
  0x38   : > { %254 = vperm.xlu1 %1409, %v240_v23   ;;  %v1231_v26 = vld [vmem:[%s1678_s23 + $0x20] sm:$0xff]  ;;  %v241_v27 = vld [vmem:[%s2137_s2 + $0x18] sm:$0xff]  ;;  %v1752_v30 = vld [vmem:[%s2136_s1 + $0x10] sm:$0xff] }
  0x39   : > { %v1741_v28 = vld [vmem:[%s2136_s1 + $0x8] sm:$0xff]  ;;  %v1763_v32 = vld [vmem:[%s2136_s1 + $0x18] sm:$0xff]  ;;  %v1219_v34 = vld [vmem:[%s1678_s23 + $0x18] sm:$0xff] }
  0x3a   : > { %v1232_v29 = vld [vmem:[%s1678_s23 + $0x60] sm:$0xff]  ;;  %v1255_v35 = vld [vmem:[%s1678_s23 + $0x30] sm:$0xff]  ;;  %v1220_v36 = vld [vmem:[%s1678_s23 + $0x58] sm:$0xff] }
  0x3b   : > { %v1233_v31 = vld [vmem:[%s1678_s23 + $0xa0] sm:$0xff]  ;;  %v1256_v37 = vld [vmem:[%s1678_s23 + $0x70] sm:$0xff]  ;;  %v1221_v38 = vld [vmem:[%s1678_s23 + $0x98] sm:$0xff] }
  0x3c   : > { %1188 = vmatmul.msk.f32.gmra.mxu0 %vm266_vm0, %v263_v3  ;;  %1200 = vmatmul.msk.f32.gmra.mxu2 %vm266_vm0, %v1196_v4  ;;  %v1234_v33 = vld [vmem:[%s1678_s23 + $0xe0] sm:$0xff]  ;;  %v1257_v39 = vld [vmem:[%s1678_s23 + $0xb0] sm:$0xff]  ;;  %v1222_v40 = vld [vmem:[%s1678_s23 + $0xd8] sm:$0xff] }
  0x3d   : > { %v1258_v41 = vld [vmem:[%s1678_s23 + $0xf0] sm:$0xff]  ;;  %v1243_v42 = vld [vmem:[%s1678_s23 + $0x28] sm:$0xff]  ;;  %v1267_v46 = vld [vmem:[%s1678_s23 + $0x38] sm:$0xff] }
  0x3e   : > { %249 = vperm.xlu0 %1408, %v239_v19   ;;  %v1244_v43 = vld [vmem:[%s1678_s23 + $0x68] sm:$0xff]  ;;  %v1268_v48 = vld [vmem:[%s1678_s23 + $0x78] sm:$0xff] }
  0x3f   : > { %v1245_v44 = vld [vmem:[%s1678_s23 + $0xa8] sm:$0xff]  ;;  %v1269_v50 = vld [vmem:[%s1678_s23 + $0xb8] sm:$0xff] }
  0x40   : > { %259 = vperm.xlu1 %1409, %v241_v27   ;;  %v1246_v45 = vld [vmem:[%s1678_s23 + $0xe8] sm:$0xff]  ;;  %v1270_v52 = vld [vmem:[%s1678_s23 + $0xf8] sm:$0xff]  ;;  %s1345_s23 = sshll.u32 %s1594_s19, 9  ;;  %s1076_s19 = scalar_lea.sflag [#allocation4], %s1674_s0 }
  0x41   : > { %s1087_s30 = scalar_lea.hbm %s2139_s4, %s1345_s23 }
  0x42   : > { %s1090_s7 = sshll.u32 %s1087_s30, 4  ;;  %s1091_s7 = int_to_ptr.hbm [resolvable:$true] %s1090_s7 }
  0x43   : > { %s1484_s25 = sshra.s32 %s1091_s7, 4  ;;  %s1485_s25 = int_to_ptr.hbm [resolvable:$true] %s1484_s25 }
  0x44   : > { %1189 = vmatmul.msk.f32.gmra.mxu0 %vm266_vm0, %v264_v5  ;;  %1201 = vmatmul.msk.f32.gmra.mxu2 %vm266_vm0, %v1197_v6  ;;  %s1486_s6 = scalar_lea.hbm %s1485_s25, 512  ;;  %p1491_p0 = scmp.lt.s32.totalorder %s1485_s25, %s2139_s4 }
  0x45   : > { %p1487_p4 = scmp.ne.s32.totalorder %s1485_s25, %s1486_s6  ;;  %p1492_p7 = scmp.lt.s32.totalorder %s1490_s12, %s1486_s6 }
  0x47   : > { %p1488_p6 = pnand %p1487_p4, %p1625_p11  ;;  %p1493_p5 = por %p1492_p7, %p1491_p0 }
  0x49   : > { %p1489_p13 = pneg %p1488_p6 }
  0x4b   : > { %p1494_p8 = pnand %p1493_p5, %p1489_p13 }
  0x4c   : > { %1190 = vmatmul.msk.f32.gmra.mxu0 %vm266_vm0, %v265_v7  ;;  %1202 = vmatmul.msk.f32.gmra.mxu2 %vm266_vm0, %v1198_v8 }
  0x54   : > { %1211 = vmatmul.msk.f32.vlgmr.msrb.gmra.mxu0 %vm266_vm0, %v1207_v9 }
  0x55   : > { %757 = vmatpush.msrb.mxu0 %v1684_v0 }
  0x5c   : > { %1212 = vmatmul.msk.f32.gmra.mxu0 %vm266_vm0, %v1208_v12 }
  0x64   : > { %1213 = vmatmul.msk.f32.gmra.mxu0 %vm266_vm0, %v1209_v17 }
  0x6c   : > { %1214 = vmatmul.msk.f32.gmra.mxu0 %vm266_vm0, %v1210_v21 }
  0x74   : > { %1235 = vmatmul.msk.f32.vlgmr.msra.gmra.mxu0 %vm266_vm0, %v1231_v26 }
  0x7c   : > { %1236 = vmatmul.msk.f32.gmra.mxu0 %vm266_vm0, %v1232_v29 }
  0x84   : > { %1237 = vmatmul.msk.f32.gmra.mxu0 %vm266_vm0, %v1233_v31 }
  0x8c   : > { %1238 = vmatmul.msk.f32.gmra.mxu0 %vm266_vm0, %v1234_v33 }
  0x94   : > { %1259 = vmatmul.msk.f32.vlgmr.msrb.gmra.mxu0 %vm266_vm0, %v1255_v35 }
  0x9c   : > { %1260 = vmatmul.msk.f32.gmra.mxu0 %vm266_vm0, %v1256_v37 }
  0xa4   : > { %1261 = vmatmul.msk.f32.gmra.mxu0 %vm266_vm0, %v1257_v39 }
  0xa8   : > { %v1806_v54 = vpop.permute.xlu0 %244 }
  0xaa   : > { %v1823_v63 = vpop.permute.xlu1 %254 }
  0xac   : > { %1262 = vmatmul.msk.f32.gmra.mxu0 %vm266_vm0, %v1258_v41 }
  0xb0   : > { %v1816_v58 = vpop.permute.xlu0 %249 }
  0xb1   : > { %v296_v10 = vpop.f32.mrf.mxu0 }
  0xb2   : > { %v1842_v12 = vpop.permute.xlu1 %259 }
  0xb7   : > { %v384_v11 = vpop.f32.mrf.mxu2 }
  0xb9   : > { %v299_v13 = vpop.f32.mrf.mxu0 }
  0xbf   : > { %v387_v16 = vpop.f32.mrf.mxu2 }
  0xc1   : > { %v302_v18 = vpop.f32.mrf.mxu0 }
  0xc7   : > { %v390_v20 = vpop.f32.mrf.mxu2 }
  0xc9   : > { %v305_v22 = vpop.f32.mrf.mxu0 }
  0xca   : > { %333 = vmatpush.msra.mxu1 %v305_v22 }
  0xcc   : > { %334 = vmatpush.msra.mxu1 %v302_v18 }
  0xce   : > { %335 = vmatpush.msra.mxu1 %v299_v13 }
  0xcf   : > { %v393_v25 = vpop.f32.mrf.mxu2 }
  0xd0   : > { %336 = vmatpush.msra.mxu1 %v296_v10  ;;  %408 = vmatpush.msra.mxu3 %v393_v25 }
  0xd1   : > { %1191 = vmatmul.msk.f32.vlgmr.msra.gmra.mxu1 %vm308_vm1, %v1727_v24  ;;  %v459_v47 = vpop.f32.mrf.mxu0 }
  0xd2   : > { %409 = vmatpush.msra.mxu3 %v390_v20  ;;  %532 = vmatpush.msrb.mxu1 %v1684_v0 }
  0xd4   : > { %682 = vmatpush.msra.mxu1 %v1684_v0  ;;  %410 = vmatpush.msra.mxu3 %v387_v16 }
  0xd6   : > { %411 = vmatpush.msra.mxu3 %v384_v11 }
  0xd7   : > { %1203 = vmatmul.msk.f32.vlgmr.msra.gmra.mxu3 %vm308_vm1, %v1727_v24 }
  0xd9   : > { %1192 = vmatmul.msk.f32.gmra.mxu1 %vm308_vm1, %v1741_v28  ;;  %v462_v49 = vpop.f32.mrf.mxu0 }
  0xdf   : > { %1204 = vmatmul.msk.f32.gmra.mxu3 %vm308_vm1, %v1741_v28 }
  0xe1   : > { %1193 = vmatmul.msk.f32.gmra.mxu1 %vm308_vm1, %v1752_v30  ;;  %v465_v51 = vpop.f32.mrf.mxu0 }
  0xe7   : > { %1205 = vmatmul.msk.f32.gmra.mxu3 %vm308_vm1, %v1752_v30 }
  0xe9   : > { %1194 = vmatmul.msk.f32.gmra.mxu1 %vm308_vm1, %v1763_v32  ;;  %v468_v53 = vpop.f32.mrf.mxu0 }
  0xea   : > { %483 = vmatpush.msrb.mxu2 %v468_v53 }
  0xec   : > { %484 = vmatpush.msrb.mxu2 %v465_v51 }
  0xee   : > { %485 = vmatpush.msrb.mxu2 %v462_v49 }
  0xef   : > { %1206 = vmatmul.msk.f32.gmra.mxu3 %vm308_vm1, %v1763_v32 }
  0xf0   : > { %486 = vmatpush.msrb.mxu2 %v459_v47 }
  0xf1   : > { %1223 = vmatmul.msk.f32.vlgmr.msrb.gmra.mxu1 %vm266_vm0, %v1219_v34  ;;  %v609_v57 = vpop.f32.mrf.mxu0  ;;  %1215 = vmatmul.msk.f32.vlgmr.msrb.gmra.mxu2 %vm308_vm1, %v1727_v24 }
  0xf2   : > { %832 = vmatpush.msrb.mxu1 %v1684_v0 }
  0xf9   : > { %1224 = vmatmul.msk.f32.gmra.mxu1 %vm266_vm0, %v1220_v36  ;;  %v612_v61 = vpop.f32.mrf.mxu0  ;;  %1216 = vmatmul.msk.f32.gmra.mxu2 %vm308_vm1, %v1741_v28 }
 0x101   : > { %1225 = vmatmul.msk.f32.gmra.mxu1 %vm266_vm0, %v1221_v38  ;;  %v615_v9 = vpop.f32.mrf.mxu0  ;;  %1217 = vmatmul.msk.f32.gmra.mxu2 %vm308_vm1, %v1752_v30 }
 0x109   : > { %1226 = vmatmul.msk.f32.gmra.mxu1 %vm266_vm0, %v1222_v40  ;;  %v618_v21 = vpop.f32.mrf.mxu0  ;;  %1218 = vmatmul.msk.f32.gmra.mxu2 %vm308_vm1, %v1763_v32 }
 0x10a   : > { %633 = vmatpush.msra.mxu2 %v618_v21 }
 0x10c   : > { %634 = vmatpush.msra.mxu2 %v615_v9 }
 0x10e   : > { %635 = vmatpush.msra.mxu2 %v612_v61 }
 0x110   : > { %636 = vmatpush.msra.mxu2 %v609_v57 }
 0x111   : > { %1247 = vmatmul.msk.f32.vlgmr.msra.gmra.mxu1 %vm266_vm0, %v1243_v42  ;;  %v759_v35 = vpop.f32.mrf.mxu0  ;;  %1239 = vmatmul.msk.f32.vlgmr.msra.gmra.mxu2 %vm308_vm1, %v1727_v24 }
 0x119   : > { %1248 = vmatmul.msk.f32.gmra.mxu1 %vm266_vm0, %v1244_v43  ;;  %1240 = vmatmul.msk.f32.gmra.mxu2 %vm308_vm1, %v1741_v28 }
 0x121   : > { %1249 = vmatmul.msk.f32.gmra.mxu1 %vm266_vm0, %v1245_v44  ;;  %1241 = vmatmul.msk.f32.gmra.mxu2 %vm308_vm1, %v1752_v30 }
 0x129   : > { %1250 = vmatmul.msk.f32.gmra.mxu1 %vm266_vm0, %v1246_v45  ;;  %v762_v45 = vpop.f32.mrf.mxu0  ;;  %1242 = vmatmul.msk.f32.gmra.mxu2 %vm308_vm1, %v1763_v32 }
 0x131   : > { %1271 = vmatmul.msk.f32.vlgmr.msrb.gmra.mxu1 %vm266_vm0, %v1267_v46  ;;  %v765_v47 = vpop.f32.mrf.mxu0 }
 0x139   : > { %1272 = vmatmul.msk.f32.gmra.mxu1 %vm266_vm0, %v1268_v48  ;;  %v768_v49 = vpop.f32.mrf.mxu0 }
 0x13a   : > { %783 = vmatpush.msrb.mxu2 %v768_v49 }
 0x13c   : > { %784 = vmatpush.msrb.mxu2 %v765_v47 }
 0x13e   : > { %785 = vmatpush.msrb.mxu2 %v762_v45 }
 0x140   : > { %786 = vmatpush.msrb.mxu2 %v759_v35 }
 0x141   : > { %1273 = vmatmul.msk.f32.gmra.mxu1 %vm266_vm0, %v1269_v50  ;;  %1263 = vmatmul.msk.f32.vlgmr.msrb.gmra.mxu2 %vm308_vm1, %v1727_v24 }
 0x149   : > { %1274 = vmatmul.msk.f32.gmra.mxu1 %vm266_vm0, %v1270_v52  ;;  %1264 = vmatmul.msk.f32.gmra.mxu2 %vm308_vm1, %v1741_v28 }
 0x14e   : > { %v338_v55 = vpop.f32.mrf.mxu1 }
 0x14f   : > { %v339_v56 = vadd.f32 %v338_v55, %v1806_v54 }
 0x151   : > { %876 = vst.msk [vmem:[%s1812_s29] sm:$0xff] %vm875_vm2, %v339_v56  ;;  %v880_v1 = vmul.f32 0.75, %v339_v56  ;;  %v897_v2 = vmul.f32 0.25, %v339_v56  ;;  %1265 = vmatmul.msk.f32.gmra.mxu2 %vm308_vm1, %v1752_v30 }
 0x156   : > { %v341_v59 = vpop.f32.mrf.mxu1 }
 0x157   : > { %v342_v60 = vadd.f32 %v341_v59, %v1816_v58 }
 0x159   : > { %877 = vst.msk [vmem:[%s1812_s29 + $0x8] sm:$0xff] %vm875_vm2, %v342_v60  ;;  %v881_v13 = vmul.f32 0.75, %v342_v60  ;;  %v898_v14 = vmul.f32 0.25, %v342_v60  ;;  %1266 = vmatmul.msk.f32.gmra.mxu2 %vm308_vm1, %v1763_v32 }
 0x15a   : > { %v413_v62 = vpop.f32.mrf.mxu3 }
 0x15b   : > { %v414_v0 = vadd.f32 %v413_v62, %v1806_v54 }
 0x15d   : > { %v1826_v3 = vmul.f32 0.25, %v414_v0  ;;  %v1828_v4 = vmul.f32 0.75, %v414_v0 }
 0x15e   : > { %v344_v5 = vpop.f32.mrf.mxu1 }
 0x15f   : > { %v888_v6 = vadd.f32 %v1826_v3, %v880_v1  ;;  %v905_v7 = vadd.f32 %v1828_v4, %v897_v2  ;;  %v345_v8 = vadd.f32 %v344_v5, %v1823_v63 }
 0x161   : > { %1279 = vst.msk [vmem:[%s1812_s29 + $0x10] sm:$0xff] %vm875_vm2, %v888_v6  ;;  %v882_v25 = vmul.f32 0.75, %v345_v8  ;;  %v899_v26 = vmul.f32 0.25, %v345_v8 }
 0x162   : > { %1283 = vst.msk [vmem:[%s1812_s29 + $0x20] sm:$0xff] %vm875_vm2, %v905_v7  ;;  %v416_v10 = vpop.f32.mrf.mxu3 }
 0x163   : > { %878 = vst.msk [vmem:[%s1812_s29 + $0x100] sm:$0xff] %vm875_vm2, %v345_v8  ;;  %v417_v11 = vadd.f32 %v416_v10, %v1816_v58 }
 0x165   : > { %v1844_v15 = vmul.f32 0.25, %v417_v11  ;;  %v1846_v16 = vmul.f32 0.75, %v417_v11 }
 0x166   : > { %v347_v17 = vpop.f32.mrf.mxu1 }
 0x167   : > { %v889_v18 = vadd.f32 %v1844_v15, %v881_v13  ;;  %v906_v19 = vadd.f32 %v1846_v16, %v898_v14  ;;  %v348_v20 = vadd.f32 %v347_v17, %v1842_v12 }
 0x169   : > { %1280 = vst.msk [vmem:[%s1812_s29 + $0x18] sm:$0xff] %vm875_vm2, %v889_v18  ;;  %v883_v38 = vmul.f32 0.75, %v348_v20  ;;  %v900_v39 = vmul.f32 0.25, %v348_v20 }
 0x16a   : > { %1284 = vst.msk [vmem:[%s1812_s29 + $0x28] sm:$0xff] %vm875_vm2, %v906_v19  ;;  %v419_v22 = vpop.f32.mrf.mxu3 }
 0x16b   : > { %879 = vst.msk [vmem:[%s1812_s29 + $0x108] sm:$0xff] %vm875_vm2, %v348_v20  ;;  %v420_v23 = vadd.f32 %v419_v22, %v1823_v63 }
 0x16d   : > { %v1860_v27 = vmul.f32 0.25, %v420_v23  ;;  %v1862_v29 = vmul.f32 0.75, %v420_v23 }
 0x16e   : > { %v534_v31 = vpop.f32.mrf.mxu1 }
 0x16f   : > { %v890_v33 = vadd.f32 %v1860_v27, %v882_v25  ;;  %v907_v34 = vadd.f32 %v1862_v29, %v899_v26 }
 0x171   : > { %1281 = vst.msk [vmem:[%s1812_s29 + $0x110] sm:$0xff] %vm875_vm2, %v890_v33 }
 0x172   : > { %1285 = vst.msk [vmem:[%s1812_s29 + $0x120] sm:$0xff] %vm875_vm2, %v907_v34  ;;  %v422_v36 = vpop.f32.mrf.mxu3 }
 0x173   : > { %v423_v37 = vadd.f32 %v422_v36, %v1842_v12 }
 0x174   : > { %v488_v60 = vpop.f32.mrf.mxu2 }
 0x175   : > { %v1873_v40 = vmul.f32 0.25, %v423_v37  ;;  %v1875_v41 = vmul.f32 0.75, %v423_v37  ;;  %v489_v61 = vadd.f32 %v488_v60, %v1806_v54 }
 0x176   : > { %v537_v42 = vpop.f32.mrf.mxu1 }
 0x177   : > { %v891_v43 = vadd.f32 %v1873_v40, %v883_v38  ;;  %v908_v44 = vadd.f32 %v1875_v41, %v900_v39  ;;  %v914_v62 = vmul.f32 0.25, %v489_v61  ;;  %v927_v0 = vmul.f32 0.75, %v489_v61 }
 0x179   : > { %1282 = vst.msk [vmem:[%s1812_s29 + $0x118] sm:$0xff] %vm875_vm2, %v891_v43  ;;  %v918_v1 = vadd.f32 %v914_v62, %v1828_v4  ;;  %v931_v2 = vadd.f32 %v927_v0, %v1826_v3 }
 0x17a   : > { %1286 = vst.msk [vmem:[%s1812_s29 + $0x128] sm:$0xff] %vm875_vm2, %v908_v44 }
 0x17b   : > { %1287 = vst.msk [vmem:[%s1812_s29 + $0x30] sm:$0xff] %vm875_vm2, %v918_v1 }
 0x17c   : > { %1291 = vst.msk [vmem:[%s1812_s29 + $0x40] sm:$0xff] %vm875_vm2, %v931_v2  ;;  %v491_v5 = vpop.f32.mrf.mxu2 }
 0x17e   : > { %v540_v46 = vpop.f32.mrf.mxu1 }
 0x184   : > { %v494_v3 = vpop.f32.mrf.mxu2 }
 0x185   : > { %v495_v8 = vadd.f32 %v494_v3, %v1823_v63 }
 0x186   : > { %v543_v48 = vpop.f32.mrf.mxu1 }
 0x187   : > { %558 = vmatpush.msrb.mxu3 %v543_v48  ;;  %v916_v9 = vmul.f32 0.25, %v495_v8 }
 0x189   : > { %559 = vmatpush.msrb.mxu3 %v540_v46  ;;  %v920_v10 = vadd.f32 %v916_v9, %v1862_v29 }
 0x18b   : > { %560 = vmatpush.msrb.mxu3 %v537_v42  ;;  %1289 = vst.msk [vmem:[%s1812_s29 + $0x130] sm:$0xff] %vm875_vm2, %v920_v10 }
 0x18c   : > { %v497_v13 = vpop.f32.mrf.mxu2 }
 0x18d   : > { %561 = vmatpush.msrb.mxu3 %v534_v31  ;;  %v498_v14 = vadd.f32 %v497_v13, %v1842_v12 }
 0x18e   : > { %v684_v50 = vpop.f32.mrf.mxu1  ;;  %1227 = vmatmul.msk.f32.vlgmr.msrb.gmra.mxu3 %vm308_vm1, %v1727_v24 }
 0x194   : > { %v638_v18 = vpop.f32.mrf.mxu2 }
 0x195   : > { %v639_v20 = vadd.f32 %v638_v18, %v1806_v54 }
 0x196   : > { %v687_v51 = vpop.f32.mrf.mxu1  ;;  %1228 = vmatmul.msk.f32.gmra.mxu3 %vm308_vm1, %v1741_v28 }
 0x197   : > { %v1954_v25 = vmul.f32 0.25, %v639_v20  ;;  %v1956_v26 = vmul.f32 0.75, %v639_v20 }
 0x19c   : > { %v641_v19 = vpop.f32.mrf.mxu2 }
 0x19d   : > { %v642_v35 = vadd.f32 %v641_v19, %v1816_v58 }
 0x19e   : > { %v690_v52 = vpop.f32.mrf.mxu1  ;;  %1229 = vmatmul.msk.f32.gmra.mxu3 %vm308_vm1, %v1752_v30 }
 0x19f   : > { %v1968_v39 = vmul.f32 0.25, %v642_v35 }
 0x1a4   : > { %v644_v22 = vpop.f32.mrf.mxu2 }
 0x1a5   : > { %v645_v47 = vadd.f32 %v644_v22, %v1823_v63 }
 0x1a6   : > { %v693_v53 = vpop.f32.mrf.mxu1  ;;  %1230 = vmatmul.msk.f32.gmra.mxu3 %vm308_vm1, %v1763_v32 }
 0x1a7   : > { %708 = vmatpush.msra.mxu3 %v693_v53 }
 0x1a9   : > { %709 = vmatpush.msra.mxu3 %v690_v52  ;;  %v1988_v52 = vmul.f32 0.75, %v645_v47 }
 0x1ab   : > { %710 = vmatpush.msra.mxu3 %v687_v51  ;;  %v1984_v51 = vmul.f32 0.25, %v645_v47 }
 0x1ad   : > { %711 = vmatpush.msra.mxu3 %v684_v50 }
 0x1ae   : > { %v834_v55 = vpop.f32.mrf.mxu1  ;;  %1251 = vmatmul.msk.f32.vlgmr.msra.gmra.mxu3 %vm308_vm1, %v1727_v24 }
 0x1b6   : > { %v837_v56 = vpop.f32.mrf.mxu1  ;;  %1252 = vmatmul.msk.f32.gmra.mxu3 %vm308_vm1, %v1741_v28 }
 0x1be   : > { %v840_v57 = vpop.f32.mrf.mxu1  ;;  %1253 = vmatmul.msk.f32.gmra.mxu3 %vm308_vm1, %v1752_v30 }
 0x1c6   : > { %v843_v59 = vpop.f32.mrf.mxu1  ;;  %1254 = vmatmul.msk.f32.gmra.mxu3 %vm308_vm1, %v1763_v32 }
 0x1c7   : > { %858 = vmatpush.msrb.mxu3 %v843_v59 }
 0x1c9   : > { %859 = vmatpush.msrb.mxu3 %v840_v57 }
 0x1cb   : > { %860 = vmatpush.msrb.mxu3 %v837_v56 }
 0x1cd   : > { %861 = vmatpush.msrb.mxu3 %v834_v55 }
 0x1ce   : > { %1275 = vmatmul.msk.f32.vlgmr.msrb.gmra.mxu3 %vm308_vm1, %v1727_v24  ;;  %v492_v24 = vadd.f32 %v491_v5, %v1816_v58 }
 0x1d0   : > { %v915_v6 = vmul.f32 0.25, %v492_v24 }
 0x1d2   : > { %v919_v7 = vadd.f32 %v915_v6, %v1846_v16  ;;  %v930_v16 = vmul.f32 0.75, %v498_v14 }
 0x1d4   : > { %1288 = vst.msk [vmem:[%s1812_s29 + $0x38] sm:$0xff] %vm875_vm2, %v919_v7 }
 0x1d6   : > { %1276 = vmatmul.msk.f32.gmra.mxu3 %vm308_vm1, %v1741_v28  ;;  %v928_v28 = vmul.f32 0.75, %v492_v24 }
 0x1d8   : > { %v932_v4 = vadd.f32 %v928_v28, %v1844_v15  ;;  %v1943_v15 = vmul.f32 0.25, %v498_v14 }
 0x1da   : > { %1292 = vst.msk [vmem:[%s1812_s29 + $0x48] sm:$0xff] %vm875_vm2, %v932_v4  ;;  %v921_v17 = vadd.f32 %v1943_v15, %v1875_v41  ;;  %v647_v41 = vpop.f32.mrf.mxu2 }
 0x1db   : > { %v648_v61 = vadd.f32 %v647_v41, %v1842_v12 }
 0x1dc   : > { %1290 = vst.msk [vmem:[%s1812_s29 + $0x138] sm:$0xff] %vm875_vm2, %v921_v17 }
 0x1dd   : > { %v2000_v2 = vmul.f32 0.25, %v648_v61  ;;  %v2004_v5 = vmul.f32 0.75, %v648_v61 }
 0x1de   : > { %1277 = vmatmul.msk.f32.gmra.mxu3 %vm308_vm1, %v1752_v30  ;;  %v929_v30 = vmul.f32 0.75, %v495_v8 }
 0x1e0   : > { %v933_v11 = vadd.f32 %v929_v30, %v1860_v27 }
 0x1e2   : > { %1293 = vst.msk [vmem:[%s1812_s29 + $0x140] sm:$0xff] %vm875_vm2, %v933_v11  ;;  %v788_v56 = vpop.f32.mrf.mxu2 }
 0x1e3   : > { %v789_v3 = vadd.f32 %v788_v56, %v1806_v54 }
 0x1e5   : > { %v2017_v11 = vmul.f32 0.25, %v789_v3  ;;  %v2021_v13 = vmul.f32 0.75, %v789_v3 }
 0x1e6   : > { %1278 = vmatmul.msk.f32.gmra.mxu3 %vm308_vm1, %v1763_v32  ;;  %v934_v32 = vadd.f32 %v930_v16, %v1873_v40  ;;  %v1972_v40 = vmul.f32 0.75, %v642_v35 }
 0x1e8   : > { %1294 = vst.msk [vmem:[%s1812_s29 + $0x148] sm:$0xff] %vm875_vm2, %v934_v32 }
 0x211   : > { %v563_v21 = vpop.f32.mrf.mxu3 }
 0x212   : > { %v564_v23 = vadd.f32 %v563_v21, %v1806_v54 }
 0x214   : > { %v940_v27 = vmul.f32 0.25, %v564_v23  ;;  %v953_v29 = vmul.f32 0.75, %v564_v23 }
 0x216   : > { %v944_v31 = vadd.f32 %v940_v27, %v927_v0  ;;  %v957_v33 = vadd.f32 %v953_v29, %v914_v62  ;;  %v970_v34 = vadd.f32 %v1954_v25, %v953_v29  ;;  %v983_v36 = vadd.f32 %v1956_v26, %v940_v27 }
 0x218   : > { %1295 = vst.msk [vmem:[%s1812_s29 + $0x50] sm:$0xff] %vm875_vm2, %v944_v31 }
 0x219   : > { %1299 = vst.msk [vmem:[%s1812_s29 + $0x60] sm:$0xff] %vm875_vm2, %v957_v33  ;;  %v566_v37 = vpop.f32.mrf.mxu3 }
 0x21a   : > { %v567_v38 = vadd.f32 %v566_v37, %v1816_v58  ;;  %1303 = vst.msk [vmem:[%s1812_s29 + $0x70] sm:$0xff] %vm875_vm2, %v970_v34 }
 0x21b   : > { %1307 = vst.msk [vmem:[%s1812_s29 + $0x80] sm:$0xff] %vm875_vm2, %v983_v36 }
 0x21c   : > { %v941_v42 = vmul.f32 0.25, %v567_v38  ;;  %v954_v43 = vmul.f32 0.75, %v567_v38 }
 0x21e   : > { %v945_v44 = vadd.f32 %v941_v42, %v928_v28  ;;  %v958_v45 = vadd.f32 %v954_v43, %v915_v6  ;;  %v971_v46 = vadd.f32 %v1968_v39, %v954_v43  ;;  %v984_v48 = vadd.f32 %v1972_v40, %v941_v42 }
 0x220   : > { %1296 = vst.msk [vmem:[%s1812_s29 + $0x58] sm:$0xff] %vm875_vm2, %v945_v44 }
 0x221   : > { %1300 = vst.msk [vmem:[%s1812_s29 + $0x68] sm:$0xff] %vm875_vm2, %v958_v45  ;;  %v569_v49 = vpop.f32.mrf.mxu3 }
 0x222   : > { %v570_v50 = vadd.f32 %v569_v49, %v1823_v63  ;;  %1304 = vst.msk [vmem:[%s1812_s29 + $0x78] sm:$0xff] %vm875_vm2, %v971_v46 }
 0x223   : > { %1308 = vst.msk [vmem:[%s1812_s29 + $0x88] sm:$0xff] %vm875_vm2, %v984_v48 }
 0x224   : > { %v942_v53 = vmul.f32 0.25, %v570_v50  ;;  %v955_v55 = vmul.f32 0.75, %v570_v50 }
 0x226   : > { %v946_v57 = vadd.f32 %v942_v53, %v929_v30  ;;  %v959_v59 = vadd.f32 %v955_v55, %v916_v9  ;;  %v972_v60 = vadd.f32 %v1984_v51, %v955_v55  ;;  %v985_v62 = vadd.f32 %v1988_v52, %v942_v53  ;;  %v791_v9 = vpop.f32.mrf.mxu2 }
 0x227   : > { %v792_v18 = vadd.f32 %v791_v9, %v1816_v58 }
 0x228   : > { %1297 = vst.msk [vmem:[%s1812_s29 + $0x150] sm:$0xff] %vm875_vm2, %v946_v57 }
 0x229   : > { %1301 = vst.msk [vmem:[%s1812_s29 + $0x160] sm:$0xff] %vm875_vm2, %v959_v59  ;;  %v572_v0 = vpop.f32.mrf.mxu3  ;;  %v1019_v23 = vmul.f32 0.25, %v792_v18 }
 0x22a   : > { %v573_v1 = vadd.f32 %v572_v0, %v1842_v12  ;;  %1305 = vst.msk [vmem:[%s1812_s29 + $0x170] sm:$0xff] %vm875_vm2, %v972_v60 }
 0x22b   : > { %1309 = vst.msk [vmem:[%s1812_s29 + $0x180] sm:$0xff] %vm875_vm2, %v985_v62 }
 0x22c   : > { %v943_v24 = vmul.f32 0.25, %v573_v1  ;;  %v956_v6 = vmul.f32 0.75, %v573_v1 }
 0x22e   : > { %v947_v28 = vadd.f32 %v943_v24, %v930_v16  ;;  %v960_v7 = vadd.f32 %v956_v6, %v1943_v15  ;;  %v973_v4 = vadd.f32 %v2000_v2, %v956_v6  ;;  %v986_v8 = vadd.f32 %v2004_v5, %v943_v24  ;;  %v794_v21 = vpop.f32.mrf.mxu2 }
 0x22f   : > { %v795_v34 = vadd.f32 %v794_v21, %v1823_v63 }
 0x230   : > { %1298 = vst.msk [vmem:[%s1812_s29 + $0x158] sm:$0xff] %vm875_vm2, %v947_v28 }
 0x231   : > { %1302 = vst.msk [vmem:[%s1812_s29 + $0x168] sm:$0xff] %vm875_vm2, %v960_v7  ;;  %v713_v30 = vpop.f32.mrf.mxu3  ;;  %v1020_v38 = vmul.f32 0.25, %v795_v34 }
 0x232   : > { %1306 = vst.msk [vmem:[%s1812_s29 + $0x178] sm:$0xff] %vm875_vm2, %v973_v4  ;;  %v714_v10 = vadd.f32 %v713_v30, %v1806_v54 }
 0x233   : > { %1310 = vst.msk [vmem:[%s1812_s29 + $0x188] sm:$0xff] %vm875_vm2, %v986_v8 }
 0x234   : > { %v992_v14 = vmul.f32 0.25, %v714_v10  ;;  %v1005_v15 = vmul.f32 0.75, %v714_v10 }
 0x236   : > { %v996_v16 = vadd.f32 %v992_v14, %v1956_v26  ;;  %v1009_v17 = vadd.f32 %v1005_v15, %v1954_v25  ;;  %v1022_v32 = vadd.f32 %v2017_v11, %v1005_v15  ;;  %v1035_v19 = vadd.f32 %v2021_v13, %v992_v14 }
 0x237   : > { %v1032_v25 = vmul.f32 0.75, %v792_v18 }
 0x238   : > { %1311 = vst.msk [vmem:[%s1812_s29 + $0x90] sm:$0xff] %vm875_vm2, %v996_v16 }
 0x239   : > { %1315 = vst.msk [vmem:[%s1812_s29 + $0xa0] sm:$0xff] %vm875_vm2, %v1009_v17  ;;  %v716_v20 = vpop.f32.mrf.mxu3 }
 0x23a   : > { %v717_v22 = vadd.f32 %v716_v20, %v1816_v58  ;;  %1319 = vst.msk [vmem:[%s1812_s29 + $0xb0] sm:$0xff] %vm875_vm2, %v1022_v32 }
 0x23b   : > { %1323 = vst.msk [vmem:[%s1812_s29 + $0xc0] sm:$0xff] %vm875_vm2, %v1035_v19 }
 0x23c   : > { %v993_v26 = vmul.f32 0.25, %v717_v22  ;;  %v1006_v27 = vmul.f32 0.75, %v717_v22 }
 0x23e   : > { %v997_v29 = vadd.f32 %v993_v26, %v1972_v40  ;;  %v1010_v31 = vadd.f32 %v1006_v27, %v1968_v39  ;;  %v1023_v33 = vadd.f32 %v1019_v23, %v1006_v27  ;;  %v1036_v35 = vadd.f32 %v1032_v25, %v993_v26  ;;  %v797_v40 = vpop.f32.mrf.mxu2 }
 0x23f   : > { %v1033_v39 = vmul.f32 0.75, %v795_v34  ;;  %v798_v46 = vadd.f32 %v797_v40, %v1842_v12 }
 0x240   : > { %1312 = vst.msk [vmem:[%s1812_s29 + $0x98] sm:$0xff] %vm875_vm2, %v997_v29 }
 0x241   : > { %1316 = vst.msk [vmem:[%s1812_s29 + $0xa8] sm:$0xff] %vm875_vm2, %v1010_v31  ;;  %v719_v36 = vpop.f32.mrf.mxu3  ;;  %v1021_v50 = vmul.f32 0.25, %v798_v46 }
 0x242   : > { %v720_v37 = vadd.f32 %v719_v36, %v1823_v63  ;;  %1320 = vst.msk [vmem:[%s1812_s29 + $0xb8] sm:$0xff] %vm875_vm2, %v1023_v33 }
 0x243   : > { %1324 = vst.msk [vmem:[%s1812_s29 + $0xc8] sm:$0xff] %vm875_vm2, %v1036_v35 }
 0x244   : > { %v994_v41 = vmul.f32 0.25, %v720_v37  ;;  %v1007_v42 = vmul.f32 0.75, %v720_v37 }
 0x246   : > { %v998_v43 = vadd.f32 %v994_v41, %v1988_v52  ;;  %v1011_v44 = vadd.f32 %v1007_v42, %v1984_v51  ;;  %v1024_v45 = vadd.f32 %v1020_v38, %v1007_v42  ;;  %v1037_v47 = vadd.f32 %v1033_v39, %v994_v41 }
 0x247   : > { %v1034_v51 = vmul.f32 0.75, %v798_v46 }
 0x248   : > { %1313 = vst.msk [vmem:[%s1812_s29 + $0x190] sm:$0xff] %vm875_vm2, %v998_v43 }
 0x249   : > { %1317 = vst.msk [vmem:[%s1812_s29 + $0x1a0] sm:$0xff] %vm875_vm2, %v1011_v44  ;;  %v722_v48 = vpop.f32.mrf.mxu3 }
 0x24a   : > { %v723_v49 = vadd.f32 %v722_v48, %v1842_v12  ;;  %1321 = vst.msk [vmem:[%s1812_s29 + $0x1b0] sm:$0xff] %vm875_vm2, %v1024_v45 }
 0x24b   : > { %1325 = vst.msk [vmem:[%s1812_s29 + $0x1c0] sm:$0xff] %vm875_vm2, %v1037_v47 }
 0x24c   : > { %v995_v52 = vmul.f32 0.25, %v723_v49  ;;  %v1008_v53 = vmul.f32 0.75, %v723_v49 }
 0x24e   : > { %v999_v55 = vadd.f32 %v995_v52, %v2004_v5  ;;  %v1012_v56 = vadd.f32 %v1008_v53, %v2000_v2  ;;  %v1025_v57 = vadd.f32 %v1021_v50, %v1008_v53  ;;  %v1038_v59 = vadd.f32 %v1034_v51, %v995_v52 }
 0x250   : > { %1314 = vst.msk [vmem:[%s1812_s29 + $0x198] sm:$0xff] %vm875_vm2, %v999_v55 }
 0x251   : > { %1318 = vst.msk [vmem:[%s1812_s29 + $0x1a8] sm:$0xff] %vm875_vm2, %v1012_v56  ;;  %v863_v60 = vpop.f32.mrf.mxu3 }
 0x252   : > { %1322 = vst.msk [vmem:[%s1812_s29 + $0x1b8] sm:$0xff] %vm875_vm2, %v1025_v57  ;;  %v864_v61 = vadd.f32 %v863_v60, %v1806_v54 }
 0x253   : > { %1326 = vst.msk [vmem:[%s1812_s29 + $0x1c8] sm:$0xff] %vm875_vm2, %v1038_v59 }
 0x254   : > { %v1044_v62 = vmul.f32 0.25, %v864_v61  ;;  %v1057_v0 = vmul.f32 0.75, %v864_v61  ;;  %1335 = vst.msk [vmem:[%s1812_s29 + $0xf0] sm:$0xff] %vm875_vm2, %v864_v61 }
 0x256   : > { %v1048_v1 = vadd.f32 %v1044_v62, %v2021_v13  ;;  %v1061_v2 = vadd.f32 %v1057_v0, %v2017_v11 }
 0x258   : > { %1327 = vst.msk [vmem:[%s1812_s29 + $0xd0] sm:$0xff] %vm875_vm2, %v1048_v1 }
 0x259   : > { %1331 = vst.msk [vmem:[%s1812_s29 + $0xe0] sm:$0xff] %vm875_vm2, %v1061_v2  ;;  %v866_v5 = vpop.f32.mrf.mxu3 }
 0x25a   : > { %v867_v54 = vadd.f32 %v866_v5, %v1816_v58 }
 0x25c   : > { %v1045_v24 = vmul.f32 0.25, %v867_v54  ;;  %v1058_v6 = vmul.f32 0.75, %v867_v54  ;;  %1336 = vst.msk [vmem:[%s1812_s29 + $0xf8] sm:$0xff] %vm875_vm2, %v867_v54 }
 0x25e   : > { %v1049_v28 = vadd.f32 %v1045_v24, %v1032_v25  ;;  %v1062_v7 = vadd.f32 %v1058_v6, %v1019_v23 }
 0x260   : > { %1328 = vst.msk [vmem:[%s1812_s29 + $0xd8] sm:$0xff] %vm875_vm2, %v1049_v28 }
 0x261   : > { %1332 = vst.msk [vmem:[%s1812_s29 + $0xe8] sm:$0xff] %vm875_vm2, %v1062_v7  ;;  %v869_v4 = vpop.f32.mrf.mxu3 }
 0x262   : > { %v870_v3 = vadd.f32 %v869_v4, %v1823_v63 }
 0x264   : > { %v1046_v8 = vmul.f32 0.25, %v870_v3  ;;  %v1059_v9 = vmul.f32 0.75, %v870_v3  ;;  %1337 = vst.msk [vmem:[%s1812_s29 + $0x1f0] sm:$0xff] %vm875_vm2, %v870_v3 }
 0x266   : > { %v1050_v58 = vadd.f32 %v1046_v8, %v1033_v39  ;;  %v1063_v30 = vadd.f32 %v1059_v9, %v1020_v38 }
 0x268   : > { %1329 = vst.msk [vmem:[%s1812_s29 + $0x1d0] sm:$0xff] %vm875_vm2, %v1050_v58 }
 0x269   : > { %1333 = vst.msk [vmem:[%s1812_s29 + $0x1e0] sm:$0xff] %vm875_vm2, %v1063_v30  ;;  %v872_v63 = vpop.f32.mrf.mxu3 }
 0x26a   : > { %v873_v10 = vadd.f32 %v872_v63, %v1842_v12 }
 0x26c   : > { %v1047_v11 = vmul.f32 0.25, %v873_v10  ;;  %v1060_v13 = vmul.f32 0.75, %v873_v10  ;;  %1338 = vst.msk [vmem:[%s1812_s29 + $0x1f8] sm:$0xff] %vm875_vm2, %v873_v10 }
 0x26e   : > { %v1051_v14 = vadd.f32 %v1047_v11, %v1034_v51  ;;  %v1064_v15 = vadd.f32 %v1060_v13, %v1021_v50 }
 0x270   : > { %1330 = vst.msk [vmem:[%s1812_s29 + $0x1d8] sm:$0xff] %vm875_vm2, %v1051_v14 }
 0x271   : > { %1334 = vst.msk [vmem:[%s1812_s29 + $0x1e8] sm:$0xff] %vm875_vm2, %v1064_v15 }
 0x272   : > { %1497 = shalt.err (!%p1494_p8)
}
 0x273   : > { %s1546_s0 = smov 128   ;;  %s1547_s14 = smov 8  }
 0x274   : > { %1352 = dma.vmem_to_hbm [thread:$0]  (%p1625_p11), %s1089_s5, 8192, %s1091_s7, %s1076_s19, %s1546_s0, %s1546_s0, %s1547_s14  }
 0x275 PF: > { %s1105_s20 = sand.u32 1, %s1528_s15   ;;  %p2148_p9 = scmp.ge.s32.totalorder %s1540_s18, 2 }
 0x276   : > { %s1106_s26 = scalar_lea.sflag [#allocation4], %s1105_s20 }
 0x277   : > { %p1363_p10 = pnand %p2148_p9, %p1629_p12 }
 0x279   : > { %p1364_p1 = pneg %p1363_p10 }
 0x27b   : > { %1523 = dma.done.wait (%p1364_p1), %s1106_s26, 8192  }
 0x27c   : > { %1525 = vsyncadd (%p1364_p1), %s1106_s26, 4294959104  ;;  %p18_p2 = scmp.ge.s32.totalorder %s1598_s21, 4   ;;  %s2149_s15 = smov %s1532_s16 }
 0x27d   : > { %s2150_s16 = smov %s1536_s17  ;;  %s2151_s17 = smov %s1610_s24 }
 0x27e   : > { %s2152_s18 = smov %s1598_s21  ;;  %20 = sbr.rel (!%p18_p2) target bundleno = 8 (0x8), region = 108 }
 0x283   :  { %1112 = vsyncpa [#allocation3], 1 }
 0x284   :  { %1114 = vsyncpa [#allocation3 + $0x1], 1 }
 0x285   :  { %1115 = vsyncpa [#allocation6], 1 }
 0x286   :  { %1117 = vsyncpa [#allocation6 + $0x1], 1 }
 0x287   :  { %1118 = vsyncpa [#allocation4], 1 }
 0x288   :  { %1120 = vsyncpa [#allocation4 + $0x1], 1 }

</bundles_post_ra>
